<compile_context>
chip_gen: v7x
topology: tpu7x:2x2x1
jax: 0.10.0
libtpu: 0.0.40
codegen_flags: <defaults>
</compile_context>

<pallas_src>
import functools

import jax
import jax.numpy as jnp
from jax.experimental import pallas as pl
from jax.experimental.pallas import tpu as pltpu

# ---- model hyperparameters (small, deterministic) ----
LENGTH_FEATURES = 4     # input feature size (and fc1 output size)
HIDDEN_SIZE = 32
NUM_LAYERS = 2
BATCH = 2
SEQ = 8


def make_lstm_kernel(num_layers: int, hidden: int, seq_len: int, batch: int):
    """Builds a Pallas kernel closure over static num_layers / hidden / seq_len / batch."""
    H = hidden
    B = batch
    T = seq_len
    n_up = num_layers - 1

    def kernel(x_ref, w_ih0_ref, w_hh0_ref, b0_ref, *args):
        # args layout: [w_ih_1, w_hh_1, b_1, ..., w_ih_{L-1}, w_hh_{L-1}, b_{L-1},
        #               fc_w, fc_b, out_ref]
        upper = args[: 3 * n_up]
        fc_w_ref = args[3 * n_up]
        fc_b_ref = args[3 * n_up + 1]
        out_ref = args[3 * n_up + 2]

        # ---- hoisted weight / bias loads (read once, stay resident in vregs) ----
        w_hh0 = w_hh0_ref[...]                                     # (H, 4H)
        w_ihs = [upper[3 * i][...] for i in range(n_up)]           # (H, 4H) each
        w_hhs = [upper[3 * i + 1][...] for i in range(n_up)]       # (H, 4H) each
        b_ups = [upper[3 * i + 2][...] for i in range(n_up)]       # (1, 4H) each

        # ---- layer-0 input projection for ALL timesteps, off the recurrent chain ----
        # One (T*B, F) @ (F, 4H) matmul (bias folded in) instead of T tiny matmuls
        # inside the loop.
        xproj = (
            jnp.dot(x_ref[...], w_ih0_ref[...], preferred_element_type=jnp.float32)
            + b0_ref[...]
        )                                                          # (T*B, 4H)

        # Tuple-of-per-layer carries: each (B, H) state lives in its own vreg.
        h = [jnp.zeros((B, H), jnp.float32) for _ in range(num_layers)]
        c = [jnp.zeros((B, H), jnp.float32) for _ in range(num_layers)]

        def cell(gates, c_prev):
            # Whole-vreg transcendentals (one sigmoid + one tanh over all 4H lanes),
            # then static lane slices for the i / f / g / o gates.
            sg = jax.nn.sigmoid(gates)
            th = jnp.tanh(gates)
            i_g = sg[:, 0:H]
            f_g = sg[:, H:2 * H]
            g_g = th[:, 2 * H:3 * H]
            o_g = sg[:, 3 * H:4 * H]
            c_new = f_g * c_prev + i_g * g_g
            h_new = o_g * jnp.tanh(c_new)
            return h_new, c_new

        # ---- fully-unrolled recurrence over the (tiny, static) time axis ----
        for t in range(T):
            # Layer 0: only the recurrent matmul is on the critical path.
            gates = xproj[t * B:(t + 1) * B, :] + jnp.dot(
                h[0], w_hh0, preferred_element_type=jnp.float32)
            h[0], c[0] = cell(gates, c[0])
            inp = h[0]
            # Layers >= 1: split ih / hh matmuls. The hh matmul depends only on the
            # previous step's h[l], so it can be scheduled alongside layer-0 compute
            # for step t; no per-step lane concatenate on the critical chain.
            for l in range(1, num_layers):
                j = l - 1
                gates = (
                    jnp.dot(inp, w_ihs[j], preferred_element_type=jnp.float32)
                    + jnp.dot(h[l], w_hhs[j], preferred_element_type=jnp.float32)
                    + b_ups[j]
                )
                h[l], c[l] = cell(gates, c[l])
                inp = h[l]

        # output[:, -1, :] of the top LSTM layer -> relu -> fc1
        last = jnp.maximum(h[num_layers - 1], 0.0)                 # (B, H)
        out_ref[...] = (
            jnp.dot(last, fc_w_ref[...], preferred_element_type=jnp.float32)
            + fc_b_ref[...]
        )

    return kernel


def init_params(key, length_features, hidden_size, num_layers):
    """Deterministic synthetic init (uniform(-1/sqrt(H), 1/sqrt(H)) like PyTorch)."""
    bound = 1.0 / jnp.sqrt(jnp.float32(hidden_size))
    params = {"lstm": []}
    for l in range(num_layers):
        in_size = length_features if l == 0 else hidden_size
        key, k1, k2, k3, k4 = jax.random.split(key, 5)
        w_ih = jax.random.uniform(k1, (4 * hidden_size, in_size), jnp.float32, -bound, bound)
        w_hh = jax.random.uniform(k2, (4 * hidden_size, hidden_size), jnp.float32, -bound, bound)
        b_ih = jax.random.uniform(k3, (4 * hidden_size,), jnp.float32, -bound, bound)
        b_hh = jax.random.uniform(k4, (4 * hidden_size,), jnp.float32, -bound, bound)
        params["lstm"].append((w_ih, w_hh, b_ih, b_hh))
    key, k1, k2 = jax.random.split(key, 3)
    fc_bound = 1.0 / jnp.sqrt(jnp.float32(hidden_size))
    params["fc_w"] = jax.random.uniform(
        k1, (length_features, hidden_size), jnp.float32, -fc_bound, fc_bound
    )
    params["fc_b"] = jax.random.uniform(
        k2, (length_features,), jnp.float32, -fc_bound, fc_bound
    )
    return params


@functools.partial(jax.jit, static_argnames=("hidden_size", "num_layers"))
def neural_network_forward(x, params, *, hidden_size, num_layers):
    """Pallas implementation of neural_network.forward. x: (B, T, F), batch_first."""
    B, T, F_ = x.shape
    H = hidden_size
    # Time-major, flattened to (T*B, F): row t*B + b holds x[b, t, :].  This makes the
    # per-step slice of the precomputed gate projection a contiguous sublane block.
    x2d = jnp.transpose(x, (1, 0, 2)).reshape(T * B, F_).astype(jnp.float32)

    w_ih0, w_hh0, b_ih0, b_hh0 = params["lstm"][0]
    inputs = [
        x2d,
        w_ih0.T,                                   # (F, 4H)
        w_hh0.T,                                   # (H, 4H)
        (b_ih0 + b_hh0)[None, :],                  # (1, 4H) pre-summed bias
    ]
    for l in range(1, num_layers):
        w_ih, w_hh, b_ih, b_hh = params["lstm"][l]
        inputs.append(w_ih.T)                      # (H, 4H)
        inputs.append(w_hh.T)                      # (H, 4H)
        inputs.append((b_ih + b_hh)[None, :])      # (1, 4H)
    inputs.append(params["fc_w"].T)                # (H, F)
    inputs.append(params["fc_b"][None, :])         # (1, F)

    kernel = make_lstm_kernel(num_layers, H, T, B)
    vmem = pl.BlockSpec(memory_space=pltpu.MemorySpace.VMEM)

    # Gridless call: single sequence, whole working set (~100 KB) resident in VMEM.
    # TODO(synk): on v7x, processing many independent sequences would warrant a
    # leading "parallel" grid axis over batch chunks to use the second TensorCore.
    out = pl.pallas_call(
        kernel,
        out_shape=jax.ShapeDtypeStruct((B, F_), jnp.float32),
        in_specs=[vmem] * len(inputs),
        out_specs=vmem,
    )(*inputs)
    return out


def reference_forward(x, params, hidden_size, num_layers):
    """Pure-JAX reference mirroring nn.LSTM + relu + Linear."""
    B, T, _ = x.shape
    H = hidden_size
    h = [jnp.zeros((B, H), jnp.float32) for _ in range(num_layers)]
    c = [jnp.zeros((B, H), jnp.float32) for _ in range(num_layers)]
    for t in range(T):
        inp = x[:, t, :]
        for l in range(num_layers):
            w_ih, w_hh, b_ih, b_hh = params["lstm"][l]
            gates = inp @ w_ih.T + h[l] @ w_hh.T + b_ih + b_hh
            i = jax.nn.sigmoid(gates[:, 0:H])
            f = jax.nn.sigmoid(gates[:, H:2 * H])
            g = jnp.tanh(gates[:, 2 * H:3 * H])
            o = jax.nn.sigmoid(gates[:, 3 * H:4 * H])
            c[l] = f * c[l] + i * g
            h[l] = o * jnp.tanh(c[l])
            inp = h[l]
    return jnp.maximum(h[-1], 0.0) @ params["fc_w"].T + params["fc_b"]


if __name__ == "__main__":
    key = jax.random.PRNGKey(0)
    key, kx = jax.random.split(key)
    x = jax.random.normal(kx, (BATCH, SEQ, LENGTH_FEATURES), jnp.float32)

    params = init_params(key, LENGTH_FEATURES, HIDDEN_SIZE, NUM_LAYERS)

    out = neural_network_forward(
        x, params, hidden_size=HIDDEN_SIZE, num_layers=NUM_LAYERS
    )
    out = jax.block_until_ready(out)

    ref = reference_forward(x, params, HIDDEN_SIZE, NUM_LAYERS)
    assert out.shape == (BATCH, LENGTH_FEATURES)
    assert jnp.allclose(out, ref, atol=1e-5, rtol=1e-5), "mismatch vs reference"

    print("KERNEL_OK")
</pallas_src>

<mosaic_0001>
module attributes {stable_mosaic.version = 11 : i64} {
  func.func @kernel(%arg0: memref<16x4xf32, #tpu.memory_space<vmem>>, %arg1: memref<4x128xf32, #tpu.memory_space<vmem>>, %arg2: memref<32x128xf32, #tpu.memory_space<vmem>>, %arg3: memref<1x128xf32, #tpu.memory_space<vmem>>, %arg4: memref<32x128xf32, #tpu.memory_space<vmem>>, %arg5: memref<32x128xf32, #tpu.memory_space<vmem>>, %arg6: memref<1x128xf32, #tpu.memory_space<vmem>>, %arg7: memref<32x4xf32, #tpu.memory_space<vmem>>, %arg8: memref<1x4xf32, #tpu.memory_space<vmem>>, %arg9: memref<2x4xf32, #tpu.memory_space<vmem>>) attributes {dimension_semantics = [], scalar_prefetch = 0 : i64, scratch_operands = 0 : i64, tpu.core_type = #tpu.core_type<tc>} {
    %c0 = arith.constant 0 : index
    %c0_0 = arith.constant 0 : index
    %0 = vector.load %arg2[%c0, %c0_0] : memref<32x128xf32, #tpu.memory_space<vmem>>, vector<32x128xf32>
    %c0_1 = arith.constant 0 : index
    %c0_2 = arith.constant 0 : index
    %1 = vector.load %arg4[%c0_1, %c0_2] : memref<32x128xf32, #tpu.memory_space<vmem>>, vector<32x128xf32>
    %c0_3 = arith.constant 0 : index
    %c0_4 = arith.constant 0 : index
    %2 = vector.load %arg5[%c0_3, %c0_4] : memref<32x128xf32, #tpu.memory_space<vmem>>, vector<32x128xf32>
    %c0_5 = arith.constant 0 : index
    %c0_6 = arith.constant 0 : index
    %3 = vector.load %arg6[%c0_5, %c0_6] : memref<1x128xf32, #tpu.memory_space<vmem>>, vector<1x128xf32>
    %c0_7 = arith.constant 0 : index
    %c0_8 = arith.constant 0 : index
    %4 = vector.load %arg0[%c0_7, %c0_8] : memref<16x4xf32, #tpu.memory_space<vmem>>, vector<16x4xf32>
    %c0_9 = arith.constant 0 : index
    %c0_10 = arith.constant 0 : index
    %5 = vector.load %arg1[%c0_9, %c0_10] : memref<4x128xf32, #tpu.memory_space<vmem>>, vector<4x128xf32>
    %cst = arith.constant dense<0.000000e+00> : vector<16x128xf32>
    %6 = tpu.matmul %4, %5, %cst {dimension_numbers = #tpu.dot_dimension_numbers<[1], [0], [0], [1], [0, 0, 1, 1], [], []>} : vector<16x4xf32>, vector<4x128xf32>, vector<16x128xf32> -> vector<16x128xf32>
    %c0_11 = arith.constant 0 : index
    %c0_12 = arith.constant 0 : index
    %7 = vector.load %arg3[%c0_11, %c0_12] : memref<1x128xf32, #tpu.memory_space<vmem>>, vector<1x128xf32>
    %8 = vector.broadcast %7 : vector<1x128xf32> to vector<16x128xf32>
    %9 = arith.addf %6, %8 : vector<16x128xf32>
    %cst_13 = arith.constant 0.000000e+00 : f32
    %10 = vector.broadcast %cst_13 : f32 to vector<2x32xf32>
    %cst_14 = arith.constant 0.000000e+00 : f32
    %11 = vector.broadcast %cst_14 : f32 to vector<2x32xf32>
    %cst_15 = arith.constant 0.000000e+00 : f32
    %12 = vector.broadcast %cst_15 : f32 to vector<2x32xf32>
    %cst_16 = arith.constant 0.000000e+00 : f32
    %13 = vector.broadcast %cst_16 : f32 to vector<2x32xf32>
    %14 = vector.extract_strided_slice %9 {offsets = [0, 0], sizes = [2, 128], strides = [1, 1]} : vector<16x128xf32> to vector<2x128xf32>
    %cst_17 = arith.constant dense<0.000000e+00> : vector<2x128xf32>
    %15 = tpu.matmul %10, %0, %cst_17 {dimension_numbers = #tpu.dot_dimension_numbers<[1], [0], [0], [1], [0, 0, 1, 1], [], []>} : vector<2x32xf32>, vector<32x128xf32>, vector<2x128xf32> -> vector<2x128xf32>
    %16 = arith.addf %14, %15 : vector<2x128xf32>
    %17 = arith.negf %16 : vector<2x128xf32>
    %18 = math.exp %17 : vector<2x128xf32>
    %cst_18 = arith.constant 1.000000e+00 : f32
    %19 = vector.broadcast %cst_18 : f32 to vector<2x128xf32>
    %20 = arith.addf %19, %18 : vector<2x128xf32>
    %21 = arith.divf %19, %20 : vector<2x128xf32>
    %22 = math.tanh %16 : vector<2x128xf32>
    %23 = vector.extract_strided_slice %21 {offsets = [0, 0], sizes = [2, 32], strides = [1, 1]} : vector<2x128xf32> to vector<2x32xf32>
    %24 = vector.extract_strided_slice %21 {offsets = [0, 32], sizes = [2, 32], strides = [1, 1]} : vector<2x128xf32> to vector<2x32xf32>
    %25 = vector.extract_strided_slice %22 {offsets = [0, 64], sizes = [2, 32], strides = [1, 1]} : vector<2x128xf32> to vector<2x32xf32>
    %26 = vector.extract_strided_slice %21 {offsets = [0, 96], sizes = [2, 32], strides = [1, 1]} : vector<2x128xf32> to vector<2x32xf32>
    %27 = arith.mulf %24, %12 : vector<2x32xf32>
    %28 = arith.mulf %23, %25 : vector<2x32xf32>
    %29 = arith.addf %27, %28 : vector<2x32xf32>
    %30 = math.tanh %29 : vector<2x32xf32>
    %31 = arith.mulf %26, %30 : vector<2x32xf32>
    %cst_19 = arith.constant dense<0.000000e+00> : vector<2x128xf32>
    %32 = tpu.matmul %31, %1, %cst_19 {dimension_numbers = #tpu.dot_dimension_numbers<[1], [0], [0], [1], [0, 0, 1, 1], [], []>} : vector<2x32xf32>, vector<32x128xf32>, vector<2x128xf32> -> vector<2x128xf32>
    %cst_20 = arith.constant dense<0.000000e+00> : vector<2x128xf32>
    %33 = tpu.matmul %11, %2, %cst_20 {dimension_numbers = #tpu.dot_dimension_numbers<[1], [0], [0], [1], [0, 0, 1, 1], [], []>} : vector<2x32xf32>, vector<32x128xf32>, vector<2x128xf32> -> vector<2x128xf32>
    %34 = arith.addf %32, %33 : vector<2x128xf32>
    %35 = vector.broadcast %3 : vector<1x128xf32> to vector<2x128xf32>
    %36 = arith.addf %34, %35 : vector<2x128xf32>
    %37 = arith.negf %36 : vector<2x128xf32>
    %38 = math.exp %37 : vector<2x128xf32>
    %cst_21 = arith.constant 1.000000e+00 : f32
    %39 = vector.broadcast %cst_21 : f32 to vector<2x128xf32>
    %40 = arith.addf %39, %38 : vector<2x128xf32>
    %41 = arith.divf %39, %40 : vector<2x128xf32>
    %42 = math.tanh %36 : vector<2x128xf32>
    %43 = vector.extract_strided_slice %41 {offsets = [0, 0], sizes = [2, 32], strides = [1, 1]} : vector<2x128xf32> to vector<2x32xf32>
    %44 = vector.extract_strided_slice %41 {offsets = [0, 32], sizes = [2, 32], strides = [1, 1]} : vector<2x128xf32> to vector<2x32xf32>
    %45 = vector.extract_strided_slice %42 {offsets = [0, 64], sizes = [2, 32], strides = [1, 1]} : vector<2x128xf32> to vector<2x32xf32>
    %46 = vector.extract_strided_slice %41 {offsets = [0, 96], sizes = [2, 32], strides = [1, 1]} : vector<2x128xf32> to vector<2x32xf32>
    %47 = arith.mulf %44, %13 : vector<2x32xf32>
    %48 = arith.mulf %43, %45 : vector<2x32xf32>
    %49 = arith.addf %47, %48 : vector<2x32xf32>
    %50 = math.tanh %49 : vector<2x32xf32>
    %51 = arith.mulf %46, %50 : vector<2x32xf32>
    %52 = vector.extract_strided_slice %9 {offsets = [2, 0], sizes = [2, 128], strides = [1, 1]} : vector<16x128xf32> to vector<2x128xf32>
    %cst_22 = arith.constant dense<0.000000e+00> : vector<2x128xf32>
    %53 = tpu.matmul %31, %0, %cst_22 {dimension_numbers = #tpu.dot_dimension_numbers<[1], [0], [0], [1], [0, 0, 1, 1], [], []>} : vector<2x32xf32>, vector<32x128xf32>, vector<2x128xf32> -> vector<2x128xf32>
    %54 = arith.addf %52, %53 : vector<2x128xf32>
    %55 = arith.negf %54 : vector<2x128xf32>
    %56 = math.exp %55 : vector<2x128xf32>
    %cst_23 = arith.constant 1.000000e+00 : f32
    %57 = vector.broadcast %cst_23 : f32 to vector<2x128xf32>
    %58 = arith.addf %57, %56 : vector<2x128xf32>
    %59 = arith.divf %57, %58 : vector<2x128xf32>
    %60 = math.tanh %54 : vector<2x128xf32>
    %61 = vector.extract_strided_slice %59 {offsets = [0, 0], sizes = [2, 32], strides = [1, 1]} : vector<2x128xf32> to vector<2x32xf32>
    %62 = vector.extract_strided_slice %59 {offsets = [0, 32], sizes = [2, 32], strides = [1, 1]} : vector<2x128xf32> to vector<2x32xf32>
    %63 = vector.extract_strided_slice %60 {offsets = [0, 64], sizes = [2, 32], strides = [1, 1]} : vector<2x128xf32> to vector<2x32xf32>
    %64 = vector.extract_strided_slice %59 {offsets = [0, 96], sizes = [2, 32], strides = [1, 1]} : vector<2x128xf32> to vector<2x32xf32>
    %65 = arith.mulf %62, %29 : vector<2x32xf32>
    %66 = arith.mulf %61, %63 : vector<2x32xf32>
    %67 = arith.addf %65, %66 : vector<2x32xf32>
    %68 = math.tanh %67 : vector<2x32xf32>
    %69 = arith.mulf %64, %68 : vector<2x32xf32>
    %cst_24 = arith.constant dense<0.000000e+00> : vector<2x128xf32>
    %70 = tpu.matmul %69, %1, %cst_24 {dimension_numbers = #tpu.dot_dimension_numbers<[1], [0], [0], [1], [0, 0, 1, 1], [], []>} : vector<2x32xf32>, vector<32x128xf32>, vector<2x128xf32> -> vector<2x128xf32>
    %cst_25 = arith.constant dense<0.000000e+00> : vector<2x128xf32>
    %71 = tpu.matmul %51, %2, %cst_25 {dimension_numbers = #tpu.dot_dimension_numbers<[1], [0], [0], [1], [0, 0, 1, 1], [], []>} : vector<2x32xf32>, vector<32x128xf32>, vector<2x128xf32> -> vector<2x128xf32>
    %72 = arith.addf %70, %71 : vector<2x128xf32>
    %73 = vector.broadcast %3 : vector<1x128xf32> to vector<2x128xf32>
    %74 = arith.addf %72, %73 : vector<2x128xf32>
    %75 = arith.negf %74 : vector<2x128xf32>
    %76 = math.exp %75 : vector<2x128xf32>
    %cst_26 = arith.constant 1.000000e+00 : f32
    %77 = vector.broadcast %cst_26 : f32 to vector<2x128xf32>
    %78 = arith.addf %77, %76 : vector<2x128xf32>
    %79 = arith.divf %77, %78 : vector<2x128xf32>
    %80 = math.tanh %74 : vector<2x128xf32>
    %81 = vector.extract_strided_slice %79 {offsets = [0, 0], sizes = [2, 32], strides = [1, 1]} : vector<2x128xf32> to vector<2x32xf32>
    %82 = vector.extract_strided_slice %79 {offsets = [0, 32], sizes = [2, 32], strides = [1, 1]} : vector<2x128xf32> to vector<2x32xf32>
    %83 = vector.extract_strided_slice %80 {offsets = [0, 64], sizes = [2, 32], strides = [1, 1]} : vector<2x128xf32> to vector<2x32xf32>
    %84 = vector.extract_strided_slice %79 {offsets = [0, 96], sizes = [2, 32], strides = [1, 1]} : vector<2x128xf32> to vector<2x32xf32>
    %85 = arith.mulf %82, %49 : vector<2x32xf32>
    %86 = arith.mulf %81, %83 : vector<2x32xf32>
    %87 = arith.addf %85, %86 : vector<2x32xf32>
    %88 = math.tanh %87 : vector<2x32xf32>
    %89 = arith.mulf %84, %88 : vector<2x32xf32>
    %90 = vector.extract_strided_slice %9 {offsets = [4, 0], sizes = [2, 128], strides = [1, 1]} : vector<16x128xf32> to vector<2x128xf32>
    %cst_27 = arith.constant dense<0.000000e+00> : vector<2x128xf32>
    %91 = tpu.matmul %69, %0, %cst_27 {dimension_numbers = #tpu.dot_dimension_numbers<[1], [0], [0], [1], [0, 0, 1, 1], [], []>} : vector<2x32xf32>, vector<32x128xf32>, vector<2x128xf32> -> vector<2x128xf32>
    %92 = arith.addf %90, %91 : vector<2x128xf32>
    %93 = arith.negf %92 : vector<2x128xf32>
    %94 = math.exp %93 : vector<2x128xf32>
    %cst_28 = arith.constant 1.000000e+00 : f32
    %95 = vector.broadcast %cst_28 : f32 to vector<2x128xf32>
    %96 = arith.addf %95, %94 : vector<2x128xf32>
    %97 = arith.divf %95, %96 : vector<2x128xf32>
    %98 = math.tanh %92 : vector<2x128xf32>
    %99 = vector.extract_strided_slice %97 {offsets = [0, 0], sizes = [2, 32], strides = [1, 1]} : vector<2x128xf32> to vector<2x32xf32>
    %100 = vector.extract_strided_slice %97 {offsets = [0, 32], sizes = [2, 32], strides = [1, 1]} : vector<2x128xf32> to vector<2x32xf32>
    %101 = vector.extract_strided_slice %98 {offsets = [0, 64], sizes = [2, 32], strides = [1, 1]} : vector<2x128xf32> to vector<2x32xf32>
    %102 = vector.extract_strided_slice %97 {offsets = [0, 96], sizes = [2, 32], strides = [1, 1]} : vector<2x128xf32> to vector<2x32xf32>
    %103 = arith.mulf %100, %67 : vector<2x32xf32>
    %104 = arith.mulf %99, %101 : vector<2x32xf32>
    %105 = arith.addf %103, %104 : vector<2x32xf32>
    %106 = math.tanh %105 : vector<2x32xf32>
    %107 = arith.mulf %102, %106 : vector<2x32xf32>
    %cst_29 = arith.constant dense<0.000000e+00> : vector<2x128xf32>
    %108 = tpu.matmul %107, %1, %cst_29 {dimension_numbers = #tpu.dot_dimension_numbers<[1], [0], [0], [1], [0, 0, 1, 1], [], []>} : vector<2x32xf32>, vector<32x128xf32>, vector<2x128xf32> -> vector<2x128xf32>
    %cst_30 = arith.constant dense<0.000000e+00> : vector<2x128xf32>
    %109 = tpu.matmul %89, %2, %cst_30 {dimension_numbers = #tpu.dot_dimension_numbers<[1], [0], [0], [1], [0, 0, 1, 1], [], []>} : vector<2x32xf32>, vector<32x128xf32>, vector<2x128xf32> -> vector<2x128xf32>
    %110 = arith.addf %108, %109 : vector<2x128xf32>
    %111 = vector.broadcast %3 : vector<1x128xf32> to vector<2x128xf32>
    %112 = arith.addf %110, %111 : vector<2x128xf32>
    %113 = arith.negf %112 : vector<2x128xf32>
    %114 = math.exp %113 : vector<2x128xf32>
    %cst_31 = arith.constant 1.000000e+00 : f32
    %115 = vector.broadcast %cst_31 : f32 to vector<2x128xf32>
    %116 = arith.addf %115, %114 : vector<2x128xf32>
    %117 = arith.divf %115, %116 : vector<2x128xf32>
    %118 = math.tanh %112 : vector<2x128xf32>
    %119 = vector.extract_strided_slice %117 {offsets = [0, 0], sizes = [2, 32], strides = [1, 1]} : vector<2x128xf32> to vector<2x32xf32>
    %120 = vector.extract_strided_slice %117 {offsets = [0, 32], sizes = [2, 32], strides = [1, 1]} : vector<2x128xf32> to vector<2x32xf32>
    %121 = vector.extract_strided_slice %118 {offsets = [0, 64], sizes = [2, 32], strides = [1, 1]} : vector<2x128xf32> to vector<2x32xf32>
    %122 = vector.extract_strided_slice %117 {offsets = [0, 96], sizes = [2, 32], strides = [1, 1]} : vector<2x128xf32> to vector<2x32xf32>
    %123 = arith.mulf %120, %87 : vector<2x32xf32>
    %124 = arith.mulf %119, %121 : vector<2x32xf32>
    %125 = arith.addf %123, %124 : vector<2x32xf32>
    %126 = math.tanh %125 : vector<2x32xf32>
    %127 = arith.mulf %122, %126 : vector<2x32xf32>
    %128 = vector.extract_strided_slice %9 {offsets = [6, 0], sizes = [2, 128], strides = [1, 1]} : vector<16x128xf32> to vector<2x128xf32>
    %cst_32 = arith.constant dense<0.000000e+00> : vector<2x128xf32>
    %129 = tpu.matmul %107, %0, %cst_32 {dimension_numbers = #tpu.dot_dimension_numbers<[1], [0], [0], [1], [0, 0, 1, 1], [], []>} : vector<2x32xf32>, vector<32x128xf32>, vector<2x128xf32> -> vector<2x128xf32>
    %130 = arith.addf %128, %129 : vector<2x128xf32>
    %131 = arith.negf %130 : vector<2x128xf32>
    %132 = math.exp %131 : vector<2x128xf32>
    %cst_33 = arith.constant 1.000000e+00 : f32
    %133 = vector.broadcast %cst_33 : f32 to vector<2x128xf32>
    %134 = arith.addf %133, %132 : vector<2x128xf32>
    %135 = arith.divf %133, %134 : vector<2x128xf32>
    %136 = math.tanh %130 : vector<2x128xf32>
    %137 = vector.extract_strided_slice %135 {offsets = [0, 0], sizes = [2, 32], strides = [1, 1]} : vector<2x128xf32> to vector<2x32xf32>
    %138 = vector.extract_strided_slice %135 {offsets = [0, 32], sizes = [2, 32], strides = [1, 1]} : vector<2x128xf32> to vector<2x32xf32>
    %139 = vector.extract_strided_slice %136 {offsets = [0, 64], sizes = [2, 32], strides = [1, 1]} : vector<2x128xf32> to vector<2x32xf32>
    %140 = vector.extract_strided_slice %135 {offsets = [0, 96], sizes = [2, 32], strides = [1, 1]} : vector<2x128xf32> to vector<2x32xf32>
    %141 = arith.mulf %138, %105 : vector<2x32xf32>
    %142 = arith.mulf %137, %139 : vector<2x32xf32>
    %143 = arith.addf %141, %142 : vector<2x32xf32>
    %144 = math.tanh %143 : vector<2x32xf32>
    %145 = arith.mulf %140, %144 : vector<2x32xf32>
    %cst_34 = arith.constant dense<0.000000e+00> : vector<2x128xf32>
    %146 = tpu.matmul %145, %1, %cst_34 {dimension_numbers = #tpu.dot_dimension_numbers<[1], [0], [0], [1], [0, 0, 1, 1], [], []>} : vector<2x32xf32>, vector<32x128xf32>, vector<2x128xf32> -> vector<2x128xf32>
    %cst_35 = arith.constant dense<0.000000e+00> : vector<2x128xf32>
    %147 = tpu.matmul %127, %2, %cst_35 {dimension_numbers = #tpu.dot_dimension_numbers<[1], [0], [0], [1], [0, 0, 1, 1], [], []>} : vector<2x32xf32>, vector<32x128xf32>, vector<2x128xf32> -> vector<2x128xf32>
    %148 = arith.addf %146, %147 : vector<2x128xf32>
    %149 = vector.broadcast %3 : vector<1x128xf32> to vector<2x128xf32>
    %150 = arith.addf %148, %149 : vector<2x128xf32>
    %151 = arith.negf %150 : vector<2x128xf32>
    %152 = math.exp %151 : vector<2x128xf32>
    %cst_36 = arith.constant 1.000000e+00 : f32
    %153 = vector.broadcast %cst_36 : f32 to vector<2x128xf32>
    %154 = arith.addf %153, %152 : vector<2x128xf32>
    %155 = arith.divf %153, %154 : vector<2x128xf32>
    %156 = math.tanh %150 : vector<2x128xf32>
    %157 = vector.extract_strided_slice %155 {offsets = [0, 0], sizes = [2, 32], strides = [1, 1]} : vector<2x128xf32> to vector<2x32xf32>
    %158 = vector.extract_strided_slice %155 {offsets = [0, 32], sizes = [2, 32], strides = [1, 1]} : vector<2x128xf32> to vector<2x32xf32>
    %159 = vector.extract_strided_slice %156 {offsets = [0, 64], sizes = [2, 32], strides = [1, 1]} : vector<2x128xf32> to vector<2x32xf32>
    %160 = vector.extract_strided_slice %155 {offsets = [0, 96], sizes = [2, 32], strides = [1, 1]} : vector<2x128xf32> to vector<2x32xf32>
    %161 = arith.mulf %158, %125 : vector<2x32xf32>
    %162 = arith.mulf %157, %159 : vector<2x32xf32>
    %163 = arith.addf %161, %162 : vector<2x32xf32>
    %164 = math.tanh %163 : vector<2x32xf32>
    %165 = arith.mulf %160, %164 : vector<2x32xf32>
    %166 = vector.extract_strided_slice %9 {offsets = [8, 0], sizes = [2, 128], strides = [1, 1]} : vector<16x128xf32> to vector<2x128xf32>
    %cst_37 = arith.constant dense<0.000000e+00> : vector<2x128xf32>
    %167 = tpu.matmul %145, %0, %cst_37 {dimension_numbers = #tpu.dot_dimension_numbers<[1], [0], [0], [1], [0, 0, 1, 1], [], []>} : vector<2x32xf32>, vector<32x128xf32>, vector<2x128xf32> -> vector<2x128xf32>
    %168 = arith.addf %166, %167 : vector<2x128xf32>
    %169 = arith.negf %168 : vector<2x128xf32>
    %170 = math.exp %169 : vector<2x128xf32>
    %cst_38 = arith.constant 1.000000e+00 : f32
    %171 = vector.broadcast %cst_38 : f32 to vector<2x128xf32>
    %172 = arith.addf %171, %170 : vector<2x128xf32>
    %173 = arith.divf %171, %172 : vector<2x128xf32>
    %174 = math.tanh %168 : vector<2x128xf32>
    %175 = vector.extract_strided_slice %173 {offsets = [0, 0], sizes = [2, 32], strides = [1, 1]} : vector<2x128xf32> to vector<2x32xf32>
    %176 = vector.extract_strided_slice %173 {offsets = [0, 32], sizes = [2, 32], strides = [1, 1]} : vector<2x128xf32> to vector<2x32xf32>
    %177 = vector.extract_strided_slice %174 {offsets = [0, 64], sizes = [2, 32], strides = [1, 1]} : vector<2x128xf32> to vector<2x32xf32>
    %178 = vector.extract_strided_slice %173 {offsets = [0, 96], sizes = [2, 32], strides = [1, 1]} : vector<2x128xf32> to vector<2x32xf32>
    %179 = arith.mulf %176, %143 : vector<2x32xf32>
    %180 = arith.mulf %175, %177 : vector<2x32xf32>
    %181 = arith.addf %179, %180 : vector<2x32xf32>
    %182 = math.tanh %181 : vector<2x32xf32>
    %183 = arith.mulf %178, %182 : vector<2x32xf32>
    %cst_39 = arith.constant dense<0.000000e+00> : vector<2x128xf32>
    %184 = tpu.matmul %183, %1, %cst_39 {dimension_numbers = #tpu.dot_dimension_numbers<[1], [0], [0], [1], [0, 0, 1, 1], [], []>} : vector<2x32xf32>, vector<32x128xf32>, vector<2x128xf32> -> vector<2x128xf32>
    %cst_40 = arith.constant dense<0.000000e+00> : vector<2x128xf32>
    %185 = tpu.matmul %165, %2, %cst_40 {dimension_numbers = #tpu.dot_dimension_numbers<[1], [0], [0], [1], [0, 0, 1, 1], [], []>} : vector<2x32xf32>, vector<32x128xf32>, vector<2x128xf32> -> vector<2x128xf32>
    %186 = arith.addf %184, %185 : vector<2x128xf32>
    %187 = vector.broadcast %3 : vector<1x128xf32> to vector<2x128xf32>
    %188 = arith.addf %186, %187 : vector<2x128xf32>
    %189 = arith.negf %188 : vector<2x128xf32>
    %190 = math.exp %189 : vector<2x128xf32>
    %cst_41 = arith.constant 1.000000e+00 : f32
    %191 = vector.broadcast %cst_41 : f32 to vector<2x128xf32>
    %192 = arith.addf %191, %190 : vector<2x128xf32>
    %193 = arith.divf %191, %192 : vector<2x128xf32>
    %194 = math.tanh %188 : vector<2x128xf32>
    %195 = vector.extract_strided_slice %193 {offsets = [0, 0], sizes = [2, 32], strides = [1, 1]} : vector<2x128xf32> to vector<2x32xf32>
    %196 = vector.extract_strided_slice %193 {offsets = [0, 32], sizes = [2, 32], strides = [1, 1]} : vector<2x128xf32> to vector<2x32xf32>
    %197 = vector.extract_strided_slice %194 {offsets = [0, 64], sizes = [2, 32], strides = [1, 1]} : vector<2x128xf32> to vector<2x32xf32>
    %198 = vector.extract_strided_slice %193 {offsets = [0, 96], sizes = [2, 32], strides = [1, 1]} : vector<2x128xf32> to vector<2x32xf32>
    %199 = arith.mulf %196, %163 : vector<2x32xf32>
    %200 = arith.mulf %195, %197 : vector<2x32xf32>
    %201 = arith.addf %199, %200 : vector<2x32xf32>
    %202 = math.tanh %201 : vector<2x32xf32>
    %203 = arith.mulf %198, %202 : vector<2x32xf32>
    %204 = vector.extract_strided_slice %9 {offsets = [10, 0], sizes = [2, 128], strides = [1, 1]} : vector<16x128xf32> to vector<2x128xf32>
    %cst_42 = arith.constant dense<0.000000e+00> : vector<2x128xf32>
    %205 = tpu.matmul %183, %0, %cst_42 {dimension_numbers = #tpu.dot_dimension_numbers<[1], [0], [0], [1], [0, 0, 1, 1], [], []>} : vector<2x32xf32>, vector<32x128xf32>, vector<2x128xf32> -> vector<2x128xf32>
    %206 = arith.addf %204, %205 : vector<2x128xf32>
    %207 = arith.negf %206 : vector<2x128xf32>
    %208 = math.exp %207 : vector<2x128xf32>
    %cst_43 = arith.constant 1.000000e+00 : f32
    %209 = vector.broadcast %cst_43 : f32 to vector<2x128xf32>
    %210 = arith.addf %209, %208 : vector<2x128xf32>
    %211 = arith.divf %209, %210 : vector<2x128xf32>
    %212 = math.tanh %206 : vector<2x128xf32>
    %213 = vector.extract_strided_slice %211 {offsets = [0, 0], sizes = [2, 32], strides = [1, 1]} : vector<2x128xf32> to vector<2x32xf32>
    %214 = vector.extract_strided_slice %211 {offsets = [0, 32], sizes = [2, 32], strides = [1, 1]} : vector<2x128xf32> to vector<2x32xf32>
    %215 = vector.extract_strided_slice %212 {offsets = [0, 64], sizes = [2, 32], strides = [1, 1]} : vector<2x128xf32> to vector<2x32xf32>
    %216 = vector.extract_strided_slice %211 {offsets = [0, 96], sizes = [2, 32], strides = [1, 1]} : vector<2x128xf32> to vector<2x32xf32>
    %217 = arith.mulf %214, %181 : vector<2x32xf32>
    %218 = arith.mulf %213, %215 : vector<2x32xf32>
    %219 = arith.addf %217, %218 : vector<2x32xf32>
    %220 = math.tanh %219 : vector<2x32xf32>
    %221 = arith.mulf %216, %220 : vector<2x32xf32>
    %cst_44 = arith.constant dense<0.000000e+00> : vector<2x128xf32>
    %222 = tpu.matmul %221, %1, %cst_44 {dimension_numbers = #tpu.dot_dimension_numbers<[1], [0], [0], [1], [0, 0, 1, 1], [], []>} : vector<2x32xf32>, vector<32x128xf32>, vector<2x128xf32> -> vector<2x128xf32>
    %cst_45 = arith.constant dense<0.000000e+00> : vector<2x128xf32>
    %223 = tpu.matmul %203, %2, %cst_45 {dimension_numbers = #tpu.dot_dimension_numbers<[1], [0], [0], [1], [0, 0, 1, 1], [], []>} : vector<2x32xf32>, vector<32x128xf32>, vector<2x128xf32> -> vector<2x128xf32>
    %224 = arith.addf %222, %223 : vector<2x128xf32>
    %225 = vector.broadcast %3 : vector<1x128xf32> to vector<2x128xf32>
    %226 = arith.addf %224, %225 : vector<2x128xf32>
    %227 = arith.negf %226 : vector<2x128xf32>
    %228 = math.exp %227 : vector<2x128xf32>
    %cst_46 = arith.constant 1.000000e+00 : f32
    %229 = vector.broadcast %cst_46 : f32 to vector<2x128xf32>
    %230 = arith.addf %229, %228 : vector<2x128xf32>
    %231 = arith.divf %229, %230 : vector<2x128xf32>
    %232 = math.tanh %226 : vector<2x128xf32>
    %233 = vector.extract_strided_slice %231 {offsets = [0, 0], sizes = [2, 32], strides = [1, 1]} : vector<2x128xf32> to vector<2x32xf32>
    %234 = vector.extract_strided_slice %231 {offsets = [0, 32], sizes = [2, 32], strides = [1, 1]} : vector<2x128xf32> to vector<2x32xf32>
    %235 = vector.extract_strided_slice %232 {offsets = [0, 64], sizes = [2, 32], strides = [1, 1]} : vector<2x128xf32> to vector<2x32xf32>
    %236 = vector.extract_strided_slice %231 {offsets = [0, 96], sizes = [2, 32], strides = [1, 1]} : vector<2x128xf32> to vector<2x32xf32>
    %237 = arith.mulf %234, %201 : vector<2x32xf32>
    %238 = arith.mulf %233, %235 : vector<2x32xf32>
    %239 = arith.addf %237, %238 : vector<2x32xf32>
    %240 = math.tanh %239 : vector<2x32xf32>
    %241 = arith.mulf %236, %240 : vector<2x32xf32>
    %242 = vector.extract_strided_slice %9 {offsets = [12, 0], sizes = [2, 128], strides = [1, 1]} : vector<16x128xf32> to vector<2x128xf32>
    %cst_47 = arith.constant dense<0.000000e+00> : vector<2x128xf32>
    %243 = tpu.matmul %221, %0, %cst_47 {dimension_numbers = #tpu.dot_dimension_numbers<[1], [0], [0], [1], [0, 0, 1, 1], [], []>} : vector<2x32xf32>, vector<32x128xf32>, vector<2x128xf32> -> vector<2x128xf32>
    %244 = arith.addf %242, %243 : vector<2x128xf32>
    %245 = arith.negf %244 : vector<2x128xf32>
    %246 = math.exp %245 : vector<2x128xf32>
    %cst_48 = arith.constant 1.000000e+00 : f32
    %247 = vector.broadcast %cst_48 : f32 to vector<2x128xf32>
    %248 = arith.addf %247, %246 : vector<2x128xf32>
    %249 = arith.divf %247, %248 : vector<2x128xf32>
    %250 = math.tanh %244 : vector<2x128xf32>
    %251 = vector.extract_strided_slice %249 {offsets = [0, 0], sizes = [2, 32], strides = [1, 1]} : vector<2x128xf32> to vector<2x32xf32>
    %252 = vector.extract_strided_slice %249 {offsets = [0, 32], sizes = [2, 32], strides = [1, 1]} : vector<2x128xf32> to vector<2x32xf32>
    %253 = vector.extract_strided_slice %250 {offsets = [0, 64], sizes = [2, 32], strides = [1, 1]} : vector<2x128xf32> to vector<2x32xf32>
    %254 = vector.extract_strided_slice %249 {offsets = [0, 96], sizes = [2, 32], strides = [1, 1]} : vector<2x128xf32> to vector<2x32xf32>
    %255 = arith.mulf %252, %219 : vector<2x32xf32>
    %256 = arith.mulf %251, %253 : vector<2x32xf32>
    %257 = arith.addf %255, %256 : vector<2x32xf32>
    %258 = math.tanh %257 : vector<2x32xf32>
    %259 = arith.mulf %254, %258 : vector<2x32xf32>
    %cst_49 = arith.constant dense<0.000000e+00> : vector<2x128xf32>
    %260 = tpu.matmul %259, %1, %cst_49 {dimension_numbers = #tpu.dot_dimension_numbers<[1], [0], [0], [1], [0, 0, 1, 1], [], []>} : vector<2x32xf32>, vector<32x128xf32>, vector<2x128xf32> -> vector<2x128xf32>
    %cst_50 = arith.constant dense<0.000000e+00> : vector<2x128xf32>
    %261 = tpu.matmul %241, %2, %cst_50 {dimension_numbers = #tpu.dot_dimension_numbers<[1], [0], [0], [1], [0, 0, 1, 1], [], []>} : vector<2x32xf32>, vector<32x128xf32>, vector<2x128xf32> -> vector<2x128xf32>
    %262 = arith.addf %260, %261 : vector<2x128xf32>
    %263 = vector.broadcast %3 : vector<1x128xf32> to vector<2x128xf32>
    %264 = arith.addf %262, %263 : vector<2x128xf32>
    %265 = arith.negf %264 : vector<2x128xf32>
    %266 = math.exp %265 : vector<2x128xf32>
    %cst_51 = arith.constant 1.000000e+00 : f32
    %267 = vector.broadcast %cst_51 : f32 to vector<2x128xf32>
    %268 = arith.addf %267, %266 : vector<2x128xf32>
    %269 = arith.divf %267, %268 : vector<2x128xf32>
    %270 = math.tanh %264 : vector<2x128xf32>
    %271 = vector.extract_strided_slice %269 {offsets = [0, 0], sizes = [2, 32], strides = [1, 1]} : vector<2x128xf32> to vector<2x32xf32>
    %272 = vector.extract_strided_slice %269 {offsets = [0, 32], sizes = [2, 32], strides = [1, 1]} : vector<2x128xf32> to vector<2x32xf32>
    %273 = vector.extract_strided_slice %270 {offsets = [0, 64], sizes = [2, 32], strides = [1, 1]} : vector<2x128xf32> to vector<2x32xf32>
    %274 = vector.extract_strided_slice %269 {offsets = [0, 96], sizes = [2, 32], strides = [1, 1]} : vector<2x128xf32> to vector<2x32xf32>
    %275 = arith.mulf %272, %239 : vector<2x32xf32>
    %276 = arith.mulf %271, %273 : vector<2x32xf32>
    %277 = arith.addf %275, %276 : vector<2x32xf32>
    %278 = math.tanh %277 : vector<2x32xf32>
    %279 = arith.mulf %274, %278 : vector<2x32xf32>
    %280 = vector.extract_strided_slice %9 {offsets = [14, 0], sizes = [2, 128], strides = [1, 1]} : vector<16x128xf32> to vector<2x128xf32>
    %cst_52 = arith.constant dense<0.000000e+00> : vector<2x128xf32>
    %281 = tpu.matmul %259, %0, %cst_52 {dimension_numbers = #tpu.dot_dimension_numbers<[1], [0], [0], [1], [0, 0, 1, 1], [], []>} : vector<2x32xf32>, vector<32x128xf32>, vector<2x128xf32> -> vector<2x128xf32>
    %282 = arith.addf %280, %281 : vector<2x128xf32>
    %283 = arith.negf %282 : vector<2x128xf32>
    %284 = math.exp %283 : vector<2x128xf32>
    %cst_53 = arith.constant 1.000000e+00 : f32
    %285 = vector.broadcast %cst_53 : f32 to vector<2x128xf32>
    %286 = arith.addf %285, %284 : vector<2x128xf32>
    %287 = arith.divf %285, %286 : vector<2x128xf32>
    %288 = math.tanh %282 : vector<2x128xf32>
    %289 = vector.extract_strided_slice %287 {offsets = [0, 0], sizes = [2, 32], strides = [1, 1]} : vector<2x128xf32> to vector<2x32xf32>
    %290 = vector.extract_strided_slice %287 {offsets = [0, 32], sizes = [2, 32], strides = [1, 1]} : vector<2x128xf32> to vector<2x32xf32>
    %291 = vector.extract_strided_slice %288 {offsets = [0, 64], sizes = [2, 32], strides = [1, 1]} : vector<2x128xf32> to vector<2x32xf32>
    %292 = vector.extract_strided_slice %287 {offsets = [0, 96], sizes = [2, 32], strides = [1, 1]} : vector<2x128xf32> to vector<2x32xf32>
    %293 = arith.mulf %290, %257 : vector<2x32xf32>
    %294 = arith.mulf %289, %291 : vector<2x32xf32>
    %295 = arith.addf %293, %294 : vector<2x32xf32>
    %296 = math.tanh %295 : vector<2x32xf32>
    %297 = arith.mulf %292, %296 : vector<2x32xf32>
    %cst_54 = arith.constant dense<0.000000e+00> : vector<2x128xf32>
    %298 = tpu.matmul %297, %1, %cst_54 {dimension_numbers = #tpu.dot_dimension_numbers<[1], [0], [0], [1], [0, 0, 1, 1], [], []>} : vector<2x32xf32>, vector<32x128xf32>, vector<2x128xf32> -> vector<2x128xf32>
    %cst_55 = arith.constant dense<0.000000e+00> : vector<2x128xf32>
    %299 = tpu.matmul %279, %2, %cst_55 {dimension_numbers = #tpu.dot_dimension_numbers<[1], [0], [0], [1], [0, 0, 1, 1], [], []>} : vector<2x32xf32>, vector<32x128xf32>, vector<2x128xf32> -> vector<2x128xf32>
    %300 = arith.addf %298, %299 : vector<2x128xf32>
    %301 = vector.broadcast %3 : vector<1x128xf32> to vector<2x128xf32>
    %302 = arith.addf %300, %301 : vector<2x128xf32>
    %303 = arith.negf %302 : vector<2x128xf32>
    %304 = math.exp %303 : vector<2x128xf32>
    %cst_56 = arith.constant 1.000000e+00 : f32
    %305 = vector.broadcast %cst_56 : f32 to vector<2x128xf32>
    %306 = arith.addf %305, %304 : vector<2x128xf32>
    %307 = arith.divf %305, %306 : vector<2x128xf32>
    %308 = math.tanh %302 : vector<2x128xf32>
    %309 = vector.extract_strided_slice %307 {offsets = [0, 0], sizes = [2, 32], strides = [1, 1]} : vector<2x128xf32> to vector<2x32xf32>
    %310 = vector.extract_strided_slice %307 {offsets = [0, 32], sizes = [2, 32], strides = [1, 1]} : vector<2x128xf32> to vector<2x32xf32>
    %311 = vector.extract_strided_slice %308 {offsets = [0, 64], sizes = [2, 32], strides = [1, 1]} : vector<2x128xf32> to vector<2x32xf32>
    %312 = vector.extract_strided_slice %307 {offsets = [0, 96], sizes = [2, 32], strides = [1, 1]} : vector<2x128xf32> to vector<2x32xf32>
    %313 = arith.mulf %310, %277 : vector<2x32xf32>
    %314 = arith.mulf %309, %311 : vector<2x32xf32>
    %315 = arith.addf %313, %314 : vector<2x32xf32>
    %316 = math.tanh %315 : vector<2x32xf32>
    %317 = arith.mulf %312, %316 : vector<2x32xf32>
    %cst_57 = arith.constant 0.000000e+00 : f32
    %318 = vector.broadcast %cst_57 : f32 to vector<2x32xf32>
    %319 = arith.maximumf %317, %318 : vector<2x32xf32>
    %c0_58 = arith.constant 0 : index
    %c0_59 = arith.constant 0 : index
    %320 = vector.load %arg7[%c0_58, %c0_59] : memref<32x4xf32, #tpu.memory_space<vmem>>, vector<32x4xf32>
    %cst_60 = arith.constant dense<0.000000e+00> : vector<2x4xf32>
    %321 = tpu.matmul %319, %320, %cst_60 {dimension_numbers = #tpu.dot_dimension_numbers<[1], [0], [0], [1], [0, 0, 1, 1], [], []>} : vector<2x32xf32>, vector<32x4xf32>, vector<2x4xf32> -> vector<2x4xf32>
    %c0_61 = arith.constant 0 : index
    %c0_62 = arith.constant 0 : index
    %322 = vector.load %arg8[%c0_61, %c0_62] : memref<1x4xf32, #tpu.memory_space<vmem>>, vector<1x4xf32>
    %323 = vector.broadcast %322 : vector<1x4xf32> to vector<2x4xf32>
    %324 = arith.addf %321, %323 : vector<2x4xf32>
    %c0_63 = arith.constant 0 : index
    %c0_64 = arith.constant 0 : index
    %325 = vector.load %arg9[%c0_63, %c0_64] : memref<2x4xf32, #tpu.memory_space<vmem>>, vector<2x4xf32>
    tpu.vector_store %arg9[%c0_63, %c0_64], %324 {strides = array<i32>} : memref<2x4xf32, #tpu.memory_space<vmem>>, vector<2x4xf32>,
    return
  }
}

</mosaic_0001>

<bundles_post_ra>
// kernel: neural_network_forward.1
= control target key start
LH: loop header
LB: loop body
LE: loop exit
PB: predicated region body
PF: predicated region fallthrough
CT: control target
= control target key end

     0   :  { %vm63_vm0 = vcmask 1043456   ;;  %v3216_v3 = vmov 0.0|0.0   ;;  %vm56_vm1 = vcmask 31744   ;;  %s3673_s0 = inlined_call_operand.vmem [shape: f32[16,4], index: 0, kind: input, shape index: {}]   ;;  %s3674_s1 = inlined_call_operand.vmem [shape: f32[4,128], index: 1, kind: input, shape index: {}]   ;;  %s3675_s2 = inlined_call_operand.vmem [shape: f32[32,128], index: 2, kind: input, shape index: {}]   ;;  %s3676_s3 = inlined_call_operand.vmem [shape: f32[1,128], index: 3, kind: input, shape index: {}]   ;;  %s3677_s4 = inlined_call_operand.vmem [shape: f32[32,128], index: 4, kind: input, shape index: {}]   ;;  %s3678_s5 = inlined_call_operand.vmem [shape: f32[32,128], index: 5, kind: input, shape index: {}]   ;;  %s3679_s6 = inlined_call_operand.vmem [shape: f32[1,128], index: 6, kind: input, shape index: {}]   ;;  %s3680_s7 = inlined_call_operand.vmem [shape: f32[32,4], index: 7, kind: input, shape index: {}]   ;;  %s3681_s8 = inlined_call_operand.vmem [shape: f32[1,4], index: 8, kind: input, shape index: {}]   ;;  %s3682_s9 = inlined_call_operand.hbm [shape: f32[2,4], index: 9, kind: output, shape index: {}]  }
   0x1   :  { %v33_v0 = vld [vmem:[%s3675_s2] sm:$0xff]  ;;  %v34_v1 = vld [vmem:[%s3675_s2 + $0x8] sm:$0xff]  ;;  %2908 = vmatprep.subr.bf16.mxu1 %v3216_v3  ;;  %v35_v7 = vld [vmem:[%s3675_s2 + $0x10] sm:$0xff] }
   0x2   :  { %v48_v2 = vld [vmem:[%s3674_s1] sm:$0xf]  ;;  %v3282_v4 = vpack.c.bf16 %v34_v1, %v33_v0  ;;  %v47_v6 = vld [vmem:[%s3673_s0 + $0x8] sm:$0xff]  ;;  %v36_v8 = vld [vmem:[%s3675_s2 + $0x18] sm:$0xff] }
   0x3   :  { %2628 = vmatprep.subr.msk.mxu0 %vm63_vm0, %v48_v2  ;;  %v46_v5 = vld [vmem:[%s3673_s0] sm:$0xff] }
   0x4   :  { %2629 = vmatpush3.msk.msra.mxu0 %vm63_vm0, %v48_v2  ;;  %2630 = vmatprep.mubr.msk.f32.mxu0 %vm56_vm1, %v46_v5 }
   0x5   :  { %14 = vsyncpa [#allocation3], 0  ;;  %2910 = vmatpush3.bf16.msra.mxu1 %v3282_v4  ;;  %2631 = vmatmul.mubr.msk.f32.vlgmr.msra.gmra.mrb[0].mxu0 %vm56_vm1, %v47_v6  ;;  %v3297_v9 = vpack.c.bf16 %v36_v8, %v35_v7  ;;  %vm3217_vm2 = vmmov 0   ;;  %v3218_v10 = vmov 0.0   ;;  %v2455_v11 = vld [vmem:[%s3676_s3] ss:$0 sm:$0xff] }
   0x6   :  { %2911 = vmatprep.subr.bf16.mxu1 %v3216_v3  ;;  %2641 = vmatprep.mubr.msk.f32.mxu1 %vm3217_vm2, %v3218_v10  ;;  %s3219_s22 = smov 64   ;;  %s3220_s3 = smov 32   ;;  %v41_v29 = vld [vmem:[%s3678_s5] sm:$0xff]  ;;  %v42_v30 = vld [vmem:[%s3678_s5 + $0x8] sm:$0xff]  ;;  %v43_v31 = vld [vmem:[%s3678_s5 + $0x10] sm:$0xff]  ;;  %vm142_vm3 = vcmask 261120  }
   0x7   :  { %2914 = vmatprep.subr.bf16.mxu0 %v3216_v3  ;;  %2652 = vmatprep.mubr.msk.f32.mxu0 %vm3217_vm2, %v3218_v10  ;;  %v3332_v32 = vpack.c.bf16 %v42_v30, %v41_v29  ;;  %v44_v33 = vld [vmem:[%s3678_s5 + $0x18] sm:$0xff]  ;;  %v37_v34 = vld [vmem:[%s3677_s4] sm:$0xff]  ;;  %v38_v35 = vld [vmem:[%s3677_s4 + $0x8] sm:$0xff]  ;;  %vm2439_vm4 = vcmask 25600  }
   0x8   :  { %v3343_v36 = vpack.c.bf16 %v38_v35, %v37_v34  ;;  %v39_v37 = vld [vmem:[%s3677_s4 + $0x10] sm:$0xff]  ;;  %v40_v38 = vld [vmem:[%s3677_s4 + $0x18] sm:$0xff]  ;;  %v3352_v39 = vpack.c.bf16 %v44_v33, %v43_v31  ;;  %v3389_v47 = vld [vmem:[%s3679_s6] ss:$0 sm:$0xff] }
   0x9   :  { %2913 = vmatpush3.bf16.msra.mxu1 %v3297_v9  ;;  %2916 = vmatpush3.bf16.msra.mxu0 %v3332_v32  ;;  %v3356_v40 = vpack.c.bf16 %v40_v38, %v39_v37 }
   0xa   :  { %2920 = vmatprep.subr.bf16.mxu1 %v3216_v3  ;;  %2917 = vmatprep.subr.bf16.mxu0 %v3216_v3 }
   0xc   :  { %2642 = vmatmul.mubr.f32.vlgmr.msra.gmra.mrb[0].mxu1 %v3218_v10 }
   0xd   :  { %2663 = vmatprep.mubr.msk.f32.mxu1 %vm3217_vm2, %v3218_v10  ;;  %2922 = vmatpush3.bf16.msra.mxu1 %v3343_v36 }
   0xe   :  { %2923 = vmatprep.subr.bf16.mxu1 %v3216_v3  ;;  %2919 = vmatpush3.bf16.msra.mxu0 %v3352_v39 }
   0xf   :  { %2926 = vmatprep.subr.bf16.mxu0 %v3216_v3 }
  0x11   :  { %2925 = vmatpush3.bf16.msra.mxu1 %v3356_v40  ;;  %2653 = vmatmul.mubr.f32.vlgmr.msra.gmra.mrb[2].mxu0 %v3218_v10 }
  0x12   :  { %2932 = vmatprep.subr.bf16.mxu1 %v3216_v3  ;;  %2928 = vmatpush3.bf16.msra.mxu0 %v3282_v4 }
  0x13   :  { %2929 = vmatprep.subr.bf16.mxu0 %v3216_v3  ;;  %2674 = vmatprep.mubr.msk.f32.mxu0 %vm3217_vm2, %v3218_v10 }
  0x16   :  { %2931 = vmatpush3.bf16.msra.mxu0 %v3297_v9 }
  0x17   :  { %2938 = vmatprep.subr.bf16.mxu0 %v3216_v3 }
  0xd8   :  { %v2632_v12 = vpop.f32.mrb[0].mxu0 }
  0xd9   :  { %v3313_v13 = vadd.f32 %v2632_v12, %v2455_v11  ;;  %v133_v14 = vpop.f32.mrb[1].mxu0 }
  0xda   :  { %v3315_v15 = vadd.f32 %v2455_v11, %v133_v14 }
  0xdf   :  { %v212_v16 = vpop.f32.mrb[0].mxu1 }
  0xe0   :  { %v216_v17 = vadd.f32 %v212_v16, %v3315_v15  ;;  %v2643_v18 = vpop.f32.mrb[1].mxu1 }
  0xe2   :  { %3064 = vtanh.f32 %v216_v17  ;;  %v2459_v20 = vmul.f32 -1.442695, %v216_v17 }
  0xe4   :  { %3066 = vpow2.f32 %v2459_v20  ;;  %v307_v44 = vpop.f32.mrb[2].mxu0 }
  0xe5   :  { %v2654_v45 = vpop.f32.mrb[3].mxu0 }
  0xec   :  { %v3065_v19 = vpop.eup %3064 }
  0xed   :  { %226 = vrot.lane.b32.xlu0 %v3065_v19, %s3219_s22 }
  0xee   :  { %v3067_v21 = vpop.eup %3066 }
  0xef   :  { %v220_v22 = vadd.f32 1.0, %v3067_v21 }
  0xf1   :  { %3068 = vrcp.f32 %v220_v22 }
  0xfb   :  { %v3069_v23 = vpop.eup %3068 }
  0xfc   :  { %v224_v26 = vmul.f32 0.0, %v3069_v23 }
 0x15f   :  { %v227_v24 = vpop.permute.xlu0 %226 }
 0x160   :  { %v229_v25 = vmul.f32 %v3069_v23, %v227_v24 }
 0x162   :  { %231 = vrot.lane.b32.xlu0 %v229_v25, %s3220_s3 }
 0x1d4   :  { %v232_v27 = vpop.permute.xlu0 %231 }
 0x1d5   :  { %v3320_v28 = vadd.f32 %v232_v27, %v224_v26 }
 0x1d7   :  { %3070 = vtanh.f32 %v3320_v28  ;;  %v499_v8 = vrot.slane %v3320_v28, 6 }
 0x1e1   :  { %v3071_v41 = vpop.eup %3070 }
 0x1e2   :  { %237 = vrot.lane.b32.xlu1 %v3071_v41, %s3219_s22 }
 0x254   :  { %v238_v42 = vpop.permute.xlu1 %237 }
 0x255   :  { %v240_v43 = vmul.f32 %v3069_v23, %v238_v42 }
 0x257   :  { %312 = vrot.lane.b32.xlu1 %v240_v43, %s3220_s3 }
 0x2c9   :  { %v313_v46 = vpop.permute.xlu1 %312 }
 0x2ca   :  { %2664 = vmatmul.mubr.msk.f32.vlgmr.msra.gmra.mrb[2].mxu1 %vm142_vm3, %v313_v46  ;;  %2675 = vmatmul.mubr.msk.f32.vlgmr.msra.gmra.mrb[4].mxu0 %vm142_vm3, %v313_v46 }
 0x2cb   :  { %2934 = vmatpush3.bf16.msra.mxu1 %v3332_v32  ;;  %2940 = vmatpush3.bf16.msra.mxu0 %v3343_v36 }
 0x2cc   :  { %2935 = vmatprep.subr.bf16.mxu1 %v3216_v3  ;;  %2941 = vmatprep.subr.bf16.mxu0 %v3216_v3 }
 0x2cd   :  { %2685 = vmatprep.mubr.msk.f32.mxu1 %vm3217_vm2, %v3218_v10  ;;  %2696 = vmatprep.mubr.msk.f32.mxu0 %vm3217_vm2, %v3218_v10 }
 0x2cf   :  { %2937 = vmatpush3.bf16.msra.mxu1 %v3352_v39  ;;  %2943 = vmatpush3.bf16.msra.mxu0 %v3356_v40 }
 0x2d0   :  { %2944 = vmatprep.subr.bf16.mxu1 %v3216_v3  ;;  %2950 = vmatprep.subr.bf16.mxu0 %v3216_v3 }
 0x39d   :  { %v382_v48 = vpop.f32.mrb[2].mxu1  ;;  %v483_v49 = vpop.f32.mrb[4].mxu0 }
 0x39e   :  { %v383_v50 = vadd.f32 %v382_v48, %v307_v44  ;;  %v488_v51 = vrot.slane %v483_v49, 6  ;;  %v2665_v52 = vpop.f32.mrb[3].mxu1  ;;  %v2676_v53 = vpop.f32.mrb[5].mxu0 }
 0x3a0   :  { %v392_v54 = vadd.f32 %v3389_v47, %v383_v50  ;;  %v490_v55 = vadd.f32 %v488_v51, %v3315_v15 }
 0x3a2   :  { %3072 = vtanh.f32 %v392_v54  ;;  %v2462_v58 = vmul.f32 -1.442695, %v392_v54  ;;  %v2464_v59 = vmul.f32 -1.442695, %v490_v55 }
 0x3a3   :  { %3074 = vtanh.f32 %v490_v55 }
 0x3a4   :  { %3076 = vpow2.f32 %v2462_v58 }
 0x3a5   :  { %3078 = vpow2.f32 %v2464_v59 }
 0x3ac   :  { %v3073_v56 = vpop.eup %3072 }
 0x3ad   :  { %v3075_v57 = vpop.eup %3074  ;;  %402 = vrot.lane.b32.xlu0 %v3073_v56, %s3219_s22 }
 0x3ae   :  { %503 = vrot.lane.b32.xlu1 %v3075_v57, %s3219_s22  ;;  %v3077_v60 = vpop.eup %3076 }
 0x3af   :  { %v3079_v61 = vpop.eup %3078  ;;  %v396_v62 = vadd.f32 1.0, %v3077_v60 }
 0x3b0   :  { %v494_v63 = vadd.f32 1.0, %v3079_v61 }
 0x3b1   :  { %3080 = vrcp.f32 %v396_v62 }
 0x3b2   :  { %3082 = vrcp.f32 %v494_v63 }
 0x3bb   :  { %v3081_v0 = vpop.eup %3080 }
 0x3bc   :  { %v3083_v2 = vpop.eup %3082  ;;  %v400_v11 = vmul.f32 0.0, %v3081_v0 }
 0x3bd   :  { %v501_v12 = vmul.f32 %v3083_v2, %v499_v8 }
 0x41f   :  { %v403_v1 = vpop.permute.xlu0 %402 }
 0x420   :  { %v504_v5 = vpop.permute.xlu1 %503  ;;  %v405_v6 = vmul.f32 %v3081_v0, %v403_v1 }
 0x421   :  { %v506_v7 = vmul.f32 %v3083_v2, %v504_v5 }
 0x422   :  { %407 = vrot.lane.b32.xlu0 %v405_v6, %s3220_s3 }
 0x423   :  { %508 = vrot.lane.b32.xlu1 %v506_v7, %s3220_s3 }
 0x494   :  { %v408_v14 = vpop.permute.xlu0 %407 }
 0x495   :  { %v509_v16 = vpop.permute.xlu1 %508  ;;  %v3398_v17 = vadd.f32 %v408_v14, %v400_v11 }
 0x496   :  { %v3400_v18 = vadd.f32 %v509_v16, %v501_v12 }
 0x497   :  { %3084 = vtanh.f32 %v3398_v17 }
 0x498   :  { %3086 = vtanh.f32 %v3400_v18  ;;  %v776_v60 = vrot.slane %v3400_v18, 6 }
 0x4a1   :  { %v3085_v19 = vpop.eup %3084 }
 0x4a2   :  { %v3087_v20 = vpop.eup %3086  ;;  %413 = vrot.lane.b32.xlu0 %v3085_v19, %s3219_s22 }
 0x4a3   :  { %514 = vrot.lane.b32.xlu1 %v3087_v20, %s3219_s22 }
 0x514   :  { %v414_v21 = vpop.permute.xlu0 %413 }
 0x515   :  { %v515_v22 = vpop.permute.xlu1 %514  ;;  %v416_v23 = vmul.f32 %v3081_v0, %v414_v21 }
 0x516   :  { %v517_v24 = vmul.f32 %v3083_v2, %v515_v22 }
 0x517   :  { %519 = vrot.lane.b32.xlu0 %v416_v23, %s3220_s3 }
 0x518   :  { %v594_v25 = vrot.slane %v517_v24, 2 }
 0x51a   :  { %595 = vrot.lane.b32.xlu1 %v594_v25, %s3220_s3 }
 0x589   :  { %v520_v26 = vpop.permute.xlu0 %519 }
 0x58a   :  { %2686 = vmatmul.mubr.msk.f32.vlgmr.msra.gmra.mrb[4].mxu1 %vm142_vm3, %v520_v26 }
 0x58b   :  { %2946 = vmatpush3.bf16.msra.mxu1 %v3282_v4  ;;  %2707 = vmatprep.mubr.msk.f32.mxu1 %vm3217_vm2, %v3218_v10 }
 0x58c   :  { %v596_v27 = vpop.permute.xlu1 %595  ;;  %2947 = vmatprep.subr.bf16.mxu1 %v3216_v3 }
 0x58d   :  { %2697 = vmatmul.mubr.msk.f32.vlgmr.msra.gmra.mrb[6].mxu0 %vm142_vm3, %v596_v27 }
 0x58e   :  { %2952 = vmatpush3.bf16.msra.mxu0 %v3332_v32  ;;  %2718 = vmatprep.mubr.msk.f32.mxu0 %vm3217_vm2, %v3218_v10 }
 0x58f   :  { %2949 = vmatpush3.bf16.msra.mxu1 %v3297_v9  ;;  %2953 = vmatprep.subr.bf16.mxu0 %v3216_v3 }
 0x590   :  { %2956 = vmatprep.subr.bf16.mxu1 %v3216_v3 }
 0x592   :  { %2708 = vmatmul.mubr.msk.f32.vlgmr.msra.gmra.mrb[6].mxu1 %vm142_vm3, %v596_v27  ;;  %2955 = vmatpush3.bf16.msra.mxu0 %v3352_v39 }
 0x593   :  { %2962 = vmatprep.subr.bf16.mxu0 %v3216_v3  ;;  %2958 = vmatpush3.bf16.msra.mxu1 %v3343_v36 }
 0x594   :  { %2959 = vmatprep.subr.bf16.mxu1 %v3216_v3  ;;  %2729 = vmatprep.mubr.msk.f32.mxu1 %vm3217_vm2, %v3218_v10 }
 0x597   :  { %2961 = vmatpush3.bf16.msra.mxu1 %v3356_v40 }
 0x598   :  { %2968 = vmatprep.subr.bf16.mxu1 %v3216_v3 }
 0x65d   :  { %v589_v28 = vpop.f32.mrb[4].mxu1 }
 0x65e   :  { %v2687_v29 = vpop.f32.mrb[5].mxu1 }
 0x660   :  { %v665_v30 = vpop.f32.mrb[6].mxu0 }
 0x661   :  { %v666_v31 = vadd.f32 %v665_v30, %v589_v28  ;;  %v2698_v33 = vpop.f32.mrb[7].mxu0 }
 0x663   :  { %v669_v34 = vadd.f32 %v3389_v47, %v666_v31 }
 0x665   :  { %3088 = vtanh.f32 %v669_v34  ;;  %v760_v35 = vpop.f32.mrb[6].mxu1  ;;  %v2467_v44 = vmul.f32 -1.442695, %v669_v34 }
 0x666   :  { %v765_v37 = vrot.slane %v760_v35, 4  ;;  %v2709_v38 = vpop.f32.mrb[7].mxu1 }
 0x668   :  { %v767_v41 = vadd.f32 %v765_v37, %v3315_v15 }
 0x66a   :  { %3090 = vtanh.f32 %v767_v41  ;;  %v2469_v45 = vmul.f32 -1.442695, %v767_v41 }
 0x66b   :  { %3092 = vpow2.f32 %v2467_v44 }
 0x66c   :  { %3094 = vpow2.f32 %v2469_v45 }
 0x66f   :  { %v3089_v42 = vpop.eup %3088 }
 0x670   :  { %679 = vrot.lane.b32.xlu0 %v3089_v42, %s3219_s22 }
 0x674   :  { %v3091_v43 = vpop.eup %3090 }
 0x675   :  { %780 = vrot.lane.b32.xlu1 %v3091_v43, %s3219_s22  ;;  %v3093_v46 = vpop.eup %3092 }
 0x676   :  { %v673_v48 = vadd.f32 1.0, %v3093_v46  ;;  %v3095_v49 = vpop.eup %3094 }
 0x677   :  { %v771_v50 = vadd.f32 1.0, %v3095_v49 }
 0x678   :  { %3096 = vrcp.f32 %v673_v48 }
 0x679   :  { %3098 = vrcp.f32 %v771_v50 }
 0x682   :  { %v3097_v51 = vpop.eup %3096 }
 0x683   :  { %v3099_v54 = vpop.eup %3098  ;;  %v677_v57 = vmul.f32 %v3097_v51, %v3398_v17 }
 0x684   :  { %v778_v61 = vmul.f32 %v3099_v54, %v776_v60 }
 0x6e2   :  { %v680_v52 = vpop.permute.xlu0 %679 }
 0x6e3   :  { %v682_v53 = vmul.f32 %v3097_v51, %v680_v52 }
 0x6e5   :  { %684 = vrot.lane.b32.xlu0 %v682_v53, %s3220_s3 }
 0x6e7   :  { %v781_v55 = vpop.permute.xlu1 %780 }
 0x6e8   :  { %v783_v56 = vmul.f32 %v3099_v54, %v781_v55 }
 0x6ea   :  { %785 = vrot.lane.b32.xlu1 %v783_v56, %s3220_s3 }
 0x757   :  { %v685_v58 = vpop.permute.xlu0 %684 }
 0x758   :  { %v3436_v59 = vadd.f32 %v685_v58, %v677_v57 }
 0x75a   :  { %3100 = vtanh.f32 %v3436_v59 }
 0x75c   :  { %v786_v62 = vpop.permute.xlu1 %785 }
 0x75d   :  { %v3440_v63 = vadd.f32 %v786_v62, %v778_v61 }
 0x75f   :  { %3102 = vtanh.f32 %v3440_v63  ;;  %v1053_v42 = vrot.slane %v3440_v63, 6 }
 0x764   :  { %v3101_v0 = vpop.eup %3100 }
 0x765   :  { %690 = vrot.lane.b32.xlu0 %v3101_v0, %s3219_s22 }
 0x769   :  { %v3103_v1 = vpop.eup %3102 }
 0x76a   :  { %791 = vrot.lane.b32.xlu1 %v3103_v1, %s3219_s22 }
 0x7d7   :  { %v691_v2 = vpop.permute.xlu0 %690 }
 0x7d8   :  { %v693_v5 = vmul.f32 %v3097_v51, %v691_v2 }
 0x7da   :  { %796 = vrot.lane.b32.xlu0 %v693_v5, %s3220_s3 }
 0x7dc   :  { %v792_v6 = vpop.permute.xlu1 %791 }
 0x7dd   :  { %v794_v7 = vmul.f32 %v3099_v54, %v792_v6 }
 0x7df   :  { %v871_v8 = vrot.slane %v794_v7, 4 }
 0x7e1   :  { %872 = vrot.lane.b32.xlu1 %v871_v8, %s3220_s3 }
 0x84c   :  { %v797_v11 = vpop.permute.xlu0 %796 }
 0x84d   :  { %2719 = vmatmul.mubr.msk.f32.vlgmr.msra.gmra.mrb[8].mxu0 %vm142_vm3, %v797_v11 }
 0x84e   :  { %2964 = vmatpush3.bf16.msra.mxu0 %v3282_v4  ;;  %2740 = vmatprep.mubr.msk.f32.mxu0 %vm3217_vm2, %v3218_v10 }
 0x84f   :  { %2965 = vmatprep.subr.bf16.mxu0 %v3216_v3 }
 0x852   :  { %2967 = vmatpush3.bf16.msra.mxu0 %v3297_v9 }
 0x853   :  { %v873_v12 = vpop.permute.xlu1 %872  ;;  %2974 = vmatprep.subr.bf16.mxu0 %v3216_v3 }
 0x854   :  { %2730 = vmatmul.mubr.msk.f32.vlgmr.msra.gmra.mrb[8].mxu1 %vm142_vm3, %v873_v12 }
 0x855   :  { %2741 = vmatmul.mubr.msk.f32.vlgmr.msra.gmra.mrb[10].mxu0 %vm142_vm3, %v873_v12  ;;  %2970 = vmatpush3.bf16.msra.mxu1 %v3332_v32 }
 0x856   :  { %2971 = vmatprep.subr.bf16.mxu1 %v3216_v3  ;;  %2976 = vmatpush3.bf16.msra.mxu0 %v3343_v36 }
 0x857   :  { %2977 = vmatprep.subr.bf16.mxu0 %v3216_v3  ;;  %2751 = vmatprep.mubr.msk.f32.mxu1 %vm3217_vm2, %v3218_v10 }
 0x858   :  { %2762 = vmatprep.mubr.msk.f32.mxu0 %vm3217_vm2, %v3218_v10 }
 0x859   :  { %2973 = vmatpush3.bf16.msra.mxu1 %v3352_v39 }
 0x85a   :  { %2979 = vmatpush3.bf16.msra.mxu0 %v3356_v40  ;;  %2980 = vmatprep.subr.bf16.mxu1 %v3216_v3 }
 0x85b   :  { %2986 = vmatprep.subr.bf16.mxu0 %v3216_v3 }
 0x920   :  { %v866_v14 = vpop.f32.mrb[8].mxu0 }
 0x921   :  { %v2720_v16 = vpop.f32.mrb[9].mxu0 }
 0x927   :  { %v942_v17 = vpop.f32.mrb[8].mxu1 }
 0x928   :  { %v943_v18 = vadd.f32 %v942_v17, %v866_v14  ;;  %v1037_v19 = vpop.f32.mrb[10].mxu0  ;;  %v2731_v20 = vpop.f32.mrb[9].mxu1 }
 0x929   :  { %v1042_v21 = vrot.slane %v1037_v19, 2  ;;  %v2742_v22 = vpop.f32.mrb[11].mxu0 }
 0x92a   :  { %v946_v23 = vadd.f32 %v3389_v47, %v943_v18 }
 0x92b   :  { %v1044_v24 = vadd.f32 %v1042_v21, %v3315_v15 }
 0x92c   :  { %3104 = vtanh.f32 %v946_v23  ;;  %v2472_v27 = vmul.f32 -1.442695, %v946_v23 }
 0x92d   :  { %3106 = vtanh.f32 %v1044_v24  ;;  %v2474_v28 = vmul.f32 -1.442695, %v1044_v24 }
 0x92e   :  { %3108 = vpow2.f32 %v2472_v27 }
 0x92f   :  { %3110 = vpow2.f32 %v2474_v28 }
 0x936   :  { %v3105_v25 = vpop.eup %3104 }
 0x937   :  { %v3107_v26 = vpop.eup %3106  ;;  %956 = vrot.lane.b32.xlu1 %v3105_v25, %s3219_s22 }
 0x938   :  { %1057 = vrot.lane.b32.xlu0 %v3107_v26, %s3219_s22  ;;  %v3109_v29 = vpop.eup %3108 }
 0x939   :  { %v3111_v30 = vpop.eup %3110  ;;  %v950_v31 = vadd.f32 1.0, %v3109_v29 }
 0x93a   :  { %v1048_v33 = vadd.f32 1.0, %v3111_v30 }
 0x93b   :  { %3112 = vrcp.f32 %v950_v31 }
 0x93c   :  { %3114 = vrcp.f32 %v1048_v33 }
 0x945   :  { %v3113_v34 = vpop.eup %3112 }
 0x946   :  { %v3115_v35 = vpop.eup %3114  ;;  %v954_v43 = vmul.f32 %v3113_v34, %v3436_v59 }
 0x947   :  { %v1055_v44 = vmul.f32 %v3115_v35, %v1053_v42 }
 0x9a9   :  { %v957_v15 = vpop.permute.xlu1 %956 }
 0x9aa   :  { %v1058_v37 = vpop.permute.xlu0 %1057  ;;  %v959_v38 = vmul.f32 %v3113_v34, %v957_v15 }
 0x9ab   :  { %v1060_v41 = vmul.f32 %v3115_v35, %v1058_v37 }
 0x9ac   :  { %961 = vrot.lane.b32.xlu1 %v959_v38, %s3220_s3 }
 0x9ad   :  { %1062 = vrot.lane.b32.xlu0 %v1060_v41, %s3220_s3 }
 0xa1e   :  { %v962_v45 = vpop.permute.xlu1 %961 }
 0xa1f   :  { %v1063_v46 = vpop.permute.xlu0 %1062  ;;  %v3476_v48 = vadd.f32 %v962_v45, %v954_v43 }
 0xa20   :  { %v3478_v49 = vadd.f32 %v1063_v46, %v1055_v44 }
 0xa21   :  { %3116 = vtanh.f32 %v3476_v48 }
 0xa22   :  { %3118 = vtanh.f32 %v3478_v49  ;;  %v1327_v25 = vrot.slane %v3478_v49, 6 }
 0xa2b   :  { %v3117_v50 = vpop.eup %3116 }
 0xa2c   :  { %v3119_v51 = vpop.eup %3118  ;;  %967 = vrot.lane.b32.xlu1 %v3117_v50, %s3219_s22 }
 0xa2d   :  { %1068 = vrot.lane.b32.xlu0 %v3119_v51, %s3219_s22 }
 0xa9e   :  { %v968_v52 = vpop.permute.xlu1 %967 }
 0xa9f   :  { %v1069_v53 = vpop.permute.xlu0 %1068  ;;  %v970_v54 = vmul.f32 %v3113_v34, %v968_v52 }
 0xaa0   :  { %v1071_v55 = vmul.f32 %v3115_v35, %v1069_v53 }
 0xaa1   :  { %1073 = vrot.lane.b32.xlu0 %v970_v54, %s3220_s3 }
 0xaa2   :  { %v1148_v56 = vrot.slane %v1071_v55, 6 }
 0xaa4   :  { %1149 = vrot.lane.b32.xlu1 %v1148_v56, %s3220_s3 }
 0xb13   :  { %v1074_v57 = vpop.permute.xlu0 %1073 }
 0xb14   :  { %2752 = vmatmul.mubr.msk.f32.vlgmr.msra.gmra.mrb[10].mxu1 %vm142_vm3, %v1074_v57 }
 0xb15   :  { %2982 = vmatpush3.bf16.msra.mxu1 %v3282_v4  ;;  %2773 = vmatprep.mubr.msk.f32.mxu1 %vm3217_vm2, %v3218_v10 }
 0xb16   :  { %v1150_v58 = vpop.permute.xlu1 %1149  ;;  %2983 = vmatprep.subr.bf16.mxu1 %v3216_v3 }
 0xb17   :  { %2763 = vmatmul.mubr.msk.f32.vlgmr.msra.gmra.mrb[12].mxu0 %vm142_vm3, %v1150_v58 }
 0xb18   :  { %2988 = vmatpush3.bf16.msra.mxu0 %v3332_v32  ;;  %2784 = vmatprep.mubr.msk.f32.mxu0 %vm3217_vm2, %v3218_v10 }
 0xb19   :  { %2985 = vmatpush3.bf16.msra.mxu1 %v3297_v9  ;;  %2989 = vmatprep.subr.bf16.mxu0 %v3216_v3 }
 0xb1a   :  { %2992 = vmatprep.subr.bf16.mxu1 %v3216_v3 }
 0xb1c   :  { %2774 = vmatmul.mubr.msk.f32.vlgmr.msra.gmra.mrb[12].mxu1 %vm142_vm3, %v1150_v58  ;;  %2991 = vmatpush3.bf16.msra.mxu0 %v3352_v39 }
 0xb1d   :  { %2994 = vmatpush3.bf16.msra.mxu1 %v3343_v36  ;;  %2998 = vmatprep.subr.bf16.mxu0 %v3216_v3 }
 0xb1e   :  { %2995 = vmatprep.subr.bf16.mxu1 %v3216_v3  ;;  %2795 = vmatprep.mubr.msk.f32.mxu1 %vm3217_vm2, %v3218_v10 }
 0xb21   :  { %2997 = vmatpush3.bf16.msra.mxu1 %v3356_v40 }
 0xb22   :  { %3004 = vmatprep.subr.bf16.mxu1 %v3216_v3 }
 0xbe7   :  { %v1143_v59 = vpop.f32.mrb[10].mxu1 }
 0xbe8   :  { %v2753_v60 = vpop.f32.mrb[11].mxu1 }
 0xbea   :  { %v1219_v61 = vpop.f32.mrb[12].mxu0 }
 0xbeb   :  { %v1220_v62 = vadd.f32 %v1219_v61, %v1143_v59  ;;  %v2764_v63 = vpop.f32.mrb[13].mxu0 }
 0xbed   :  { %v1223_v0 = vadd.f32 %v3389_v47, %v1220_v62 }
 0xbef   :  { %3120 = vtanh.f32 %v1223_v0  ;;  %v1314_v1 = vpop.f32.mrb[12].mxu1  ;;  %v2477_v8 = vmul.f32 -1.442695, %v1223_v0 }
 0xbf0   :  { %v1318_v2 = vadd.f32 %v1314_v1, %v3313_v13  ;;  %v2775_v5 = vpop.f32.mrb[13].mxu1 }
 0xbf2   :  { %3122 = vtanh.f32 %v1318_v2  ;;  %v2479_v11 = vmul.f32 -1.442695, %v1318_v2 }
 0xbf3   :  { %3124 = vpow2.f32 %v2477_v8 }
 0xbf4   :  { %3126 = vpow2.f32 %v2479_v11 }
 0xbf9   :  { %v3121_v6 = vpop.eup %3120 }
 0xbfa   :  { %1233 = vrot.lane.b32.xlu0 %v3121_v6, %s3219_s22 }
 0xbfc   :  { %v3123_v7 = vpop.eup %3122 }
 0xbfd   :  { %1331 = vrot.lane.b32.xlu1 %v3123_v7, %s3219_s22  ;;  %v3125_v12 = vpop.eup %3124 }
 0xbfe   :  { %v3127_v14 = vpop.eup %3126  ;;  %v1227_v16 = vadd.f32 1.0, %v3125_v12 }
 0xbff   :  { %v1322_v17 = vadd.f32 1.0, %v3127_v14 }
 0xc00   :  { %3128 = vrcp.f32 %v1227_v16 }
 0xc01   :  { %3130 = vrcp.f32 %v1322_v17 }
 0xc0a   :  { %v3129_v18 = vpop.eup %3128 }
 0xc0b   :  { %v3131_v21 = vpop.eup %3130  ;;  %v1231_v24 = vmul.f32 %v3129_v18, %v3476_v48 }
 0xc0c   :  { %v1329_v28 = vmul.f32 %v3131_v21, %v1327_v25 }
 0xc6c   :  { %v1234_v19 = vpop.permute.xlu0 %1233 }
 0xc6d   :  { %v1236_v20 = vmul.f32 %v3129_v18, %v1234_v19 }
 0xc6f   :  { %1238 = vrot.lane.b32.xlu0 %v1236_v20, %s3220_s3  ;;  %v1332_v22 = vpop.permute.xlu1 %1331 }
 0xc70   :  { %v1334_v23 = vmul.f32 %v3131_v21, %v1332_v22 }
 0xc72   :  { %1336 = vrot.lane.b32.xlu1 %v1334_v23, %s3220_s3 }
 0xce1   :  { %v1239_v26 = vpop.permute.xlu0 %1238 }
 0xce2   :  { %v3515_v27 = vadd.f32 %v1239_v26, %v1231_v24 }
 0xce4   :  { %3132 = vtanh.f32 %v3515_v27  ;;  %v1337_v29 = vpop.permute.xlu1 %1336 }
 0xce5   :  { %v3518_v30 = vadd.f32 %v1337_v29, %v1329_v28 }
 0xce7   :  { %3134 = vtanh.f32 %v3518_v30  ;;  %v1603_v8 = vrot.slane %v3518_v30, 6 }
 0xcee   :  { %v3133_v31 = vpop.eup %3132 }
 0xcef   :  { %1244 = vrot.lane.b32.xlu0 %v3133_v31, %s3219_s22 }
 0xcf1   :  { %v3135_v33 = vpop.eup %3134 }
 0xcf2   :  { %1342 = vrot.lane.b32.xlu1 %v3135_v33, %s3219_s22 }
 0xd61   :  { %v1245_v34 = vpop.permute.xlu0 %1244 }
 0xd62   :  { %v1247_v15 = vmul.f32 %v3129_v18, %v1245_v34 }
 0xd64   :  { %1347 = vrot.lane.b32.xlu0 %v1247_v15, %s3220_s3  ;;  %v1343_v35 = vpop.permute.xlu1 %1342 }
 0xd65   :  { %v1345_v37 = vmul.f32 %v3131_v21, %v1343_v35 }
 0xd67   :  { %1422 = vrot.lane.b32.xlu1 %v1345_v37, %s3220_s3 }
 0xdd6   :  { %v1348_v38 = vpop.permute.xlu0 %1347 }
 0xdd7   :  { %2785 = vmatmul.mubr.msk.f32.vlgmr.msra.gmra.mrb[14].mxu0 %vm142_vm3, %v1348_v38 }
 0xdd8   :  { %3000 = vmatpush3.bf16.msra.mxu0 %v3282_v4  ;;  %2806 = vmatprep.mubr.msk.f32.mxu0 %vm3217_vm2, %v3218_v10 }
 0xdd9   :  { %v1423_v41 = vpop.permute.xlu1 %1422  ;;  %3001 = vmatprep.subr.bf16.mxu0 %v3216_v3 }
 0xdda   :  { %2796 = vmatmul.mubr.msk.f32.vlgmr.msra.gmra.mrb[14].mxu1 %vm142_vm3, %v1423_v41 }
 0xddb   :  { %3006 = vmatpush3.bf16.msra.mxu1 %v3332_v32  ;;  %2817 = vmatprep.mubr.msk.f32.mxu1 %vm3217_vm2, %v3218_v10 }
 0xddc   :  { %3003 = vmatpush3.bf16.msra.mxu0 %v3297_v9  ;;  %3007 = vmatprep.subr.bf16.mxu1 %v3216_v3 }
 0xddd   :  { %3010 = vmatprep.subr.bf16.mxu0 %v3216_v3 }
 0xddf   :  { %2807 = vmatmul.mubr.msk.f32.vlgmr.msra.gmra.mrb[16].mxu0 %vm142_vm3, %v1423_v41  ;;  %3009 = vmatpush3.bf16.msra.mxu1 %v3352_v39 }
 0xde0   :  { %3012 = vmatpush3.bf16.msra.mxu0 %v3343_v36  ;;  %3016 = vmatprep.subr.bf16.mxu1 %v3216_v3 }
 0xde1   :  { %3013 = vmatprep.subr.bf16.mxu0 %v3216_v3  ;;  %2828 = vmatprep.mubr.msk.f32.mxu0 %vm3217_vm2, %v3218_v10 }
 0xde4   :  { %3015 = vmatpush3.bf16.msra.mxu0 %v3356_v40 }
 0xde5   :  { %3022 = vmatprep.subr.bf16.mxu0 %v3216_v3 }
 0xeaa   :  { %v1417_v42 = vpop.f32.mrb[14].mxu0 }
 0xeab   :  { %v2786_v43 = vpop.f32.mrb[15].mxu0 }
 0xead   :  { %v1492_v44 = vpop.f32.mrb[14].mxu1 }
 0xeae   :  { %v1493_v45 = vadd.f32 %v1492_v44, %v1417_v42  ;;  %v2797_v46 = vpop.f32.mrb[15].mxu1 }
 0xeb0   :  { %v1496_v48 = vadd.f32 %v3389_v47, %v1493_v45 }
 0xeb2   :  { %3136 = vtanh.f32 %v1496_v48  ;;  %v1587_v49 = vpop.f32.mrb[16].mxu0  ;;  %v2482_v55 = vmul.f32 -1.442695, %v1496_v48 }
 0xeb3   :  { %v1592_v50 = vrot.slane %v1587_v49, 6  ;;  %v2808_v51 = vpop.f32.mrb[17].mxu0 }
 0xeb5   :  { %v1594_v52 = vadd.f32 %v1592_v50, %v3313_v13 }
 0xeb7   :  { %3138 = vtanh.f32 %v1594_v52  ;;  %v2484_v56 = vmul.f32 -1.442695, %v1594_v52 }
 0xeb8   :  { %3140 = vpow2.f32 %v2482_v55 }
 0xeb9   :  { %3142 = vpow2.f32 %v2484_v56 }
 0xebc   :  { %v3137_v53 = vpop.eup %3136 }
 0xebd   :  { %1506 = vrot.lane.b32.xlu0 %v3137_v53, %s3219_s22 }
 0xec1   :  { %v3139_v54 = vpop.eup %3138 }
 0xec2   :  { %1607 = vrot.lane.b32.xlu1 %v3139_v54, %s3219_s22  ;;  %v3141_v57 = vpop.eup %3140 }
 0xec3   :  { %v1500_v58 = vadd.f32 1.0, %v3141_v57  ;;  %v3143_v59 = vpop.eup %3142 }
 0xec4   :  { %v1598_v60 = vadd.f32 1.0, %v3143_v59 }
 0xec5   :  { %3144 = vrcp.f32 %v1500_v58 }
 0xec6   :  { %3146 = vrcp.f32 %v1598_v60 }
 0xecf   :  { %v3145_v61 = vpop.eup %3144 }
 0xed0   :  { %v3147_v0 = vpop.eup %3146  ;;  %v1504_v5 = vmul.f32 %v3145_v61, %v3515_v27 }
 0xed1   :  { %v1605_v11 = vmul.f32 %v3147_v0, %v1603_v8 }
 0xf2f   :  { %v1507_v62 = vpop.permute.xlu0 %1506 }
 0xf30   :  { %v1509_v63 = vmul.f32 %v3145_v61, %v1507_v62 }
 0xf32   :  { %1511 = vrot.lane.b32.xlu0 %v1509_v63, %s3220_s3 }
 0xf34   :  { %v1608_v1 = vpop.permute.xlu1 %1607 }
 0xf35   :  { %v1610_v2 = vmul.f32 %v3147_v0, %v1608_v1 }
 0xf37   :  { %1612 = vrot.lane.b32.xlu1 %v1610_v2, %s3220_s3 }
 0xfa4   :  { %v1512_v6 = vpop.permute.xlu0 %1511 }
 0xfa5   :  { %v3553_v7 = vadd.f32 %v1512_v6, %v1504_v5 }
 0xfa7   :  { %3148 = vtanh.f32 %v3553_v7 }
 0xfa9   :  { %v1613_v12 = vpop.permute.xlu1 %1612 }
 0xfaa   :  { %v3557_v14 = vadd.f32 %v1613_v12, %v1605_v11 }
 0xfac   :  { %3150 = vtanh.f32 %v3557_v14  ;;  %v1880_v53 = vrot.slane %v3557_v14, 6 }
 0xfb1   :  { %v3149_v16 = vpop.eup %3148 }
 0xfb2   :  { %1517 = vrot.lane.b32.xlu0 %v3149_v16, %s3219_s22 }
 0xfb6   :  { %v3151_v17 = vpop.eup %3150 }
 0xfb7   :  { %1618 = vrot.lane.b32.xlu1 %v3151_v17, %s3219_s22 }
0x1024   :  { %v1518_v18 = vpop.permute.xlu0 %1517 }
0x1025   :  { %v1520_v19 = vmul.f32 %v3145_v61, %v1518_v18 }
0x1027   :  { %1623 = vrot.lane.b32.xlu0 %v1520_v19, %s3220_s3 }
0x1029   :  { %v1619_v20 = vpop.permute.xlu1 %1618 }
0x102a   :  { %v1621_v21 = vmul.f32 %v3147_v0, %v1619_v20 }
0x102c   :  { %v1698_v22 = vrot.slane %v1621_v21, 2 }
0x102e   :  { %1699 = vrot.lane.b32.xlu1 %v1698_v22, %s3220_s3 }
0x1099   :  { %v1624_v23 = vpop.permute.xlu0 %1623 }
0x109a   :  { %2818 = vmatmul.mubr.msk.f32.vlgmr.msra.gmra.mrb[16].mxu1 %vm142_vm3, %v1624_v23 }
0x109b   :  { %3018 = vmatpush3.bf16.msra.mxu1 %v3282_v4  ;;  %2839 = vmatprep.mubr.msk.f32.mxu1 %vm3217_vm2, %v3218_v10 }
0x109c   :  { %3019 = vmatprep.subr.bf16.mxu1 %v3216_v3 }
0x109f   :  { %3021 = vmatpush3.bf16.msra.mxu1 %v3297_v9 }
0x10a0   :  { %v1700_v24 = vpop.permute.xlu1 %1699  ;;  %3028 = vmatprep.subr.bf16.mxu1 %v3216_v3 }
0x10a1   :  { %2829 = vmatmul.mubr.msk.f32.vlgmr.msra.gmra.mrb[18].mxu0 %vm142_vm3, %v1700_v24 }
0x10a2   :  { %2840 = vmatmul.mubr.msk.f32.vlgmr.msra.gmra.mrb[18].mxu1 %vm142_vm3, %v1700_v24  ;;  %3024 = vmatpush3.bf16.msra.mxu0 %v3332_v32 }
0x10a3   :  { %3025 = vmatprep.subr.bf16.mxu0 %v3216_v3  ;;  %3030 = vmatpush3.bf16.msra.mxu1 %v3343_v36 }
0x10a4   :  { %2850 = vmatprep.mubr.msk.f32.mxu0 %vm3217_vm2, %v3218_v10  ;;  %3031 = vmatprep.subr.bf16.mxu1 %v3216_v3 }
0x10a5   :  { %2861 = vmatprep.mubr.msk.f32.mxu1 %vm3217_vm2, %v3218_v10 }
0x10a6   :  { %3027 = vmatpush3.bf16.msra.mxu0 %v3352_v39 }
0x10a7   :  { %3034 = vmatprep.subr.bf16.mxu0 %v3216_v3  ;;  %3033 = vmatpush3.bf16.msra.mxu1 %v3356_v40 }
0x10a8   :  { %3040 = vmatprep.subr.bf16.mxu1 %v3216_v3 }
0x116d   :  { %v1693_v25 = vpop.f32.mrb[16].mxu1 }
0x116e   :  { %v2819_v26 = vpop.f32.mrb[17].mxu1 }
0x1174   :  { %v1769_v27 = vpop.f32.mrb[18].mxu0 }
0x1175   :  { %v1770_v28 = vadd.f32 %v1769_v27, %v1693_v25  ;;  %v2830_v29 = vpop.f32.mrb[19].mxu0  ;;  %v1864_v30 = vpop.f32.mrb[18].mxu1 }
0x1176   :  { %v1869_v31 = vrot.slane %v1864_v30, 4  ;;  %v2841_v33 = vpop.f32.mrb[19].mxu1 }
0x1177   :  { %v1773_v34 = vadd.f32 %v3389_v47, %v1770_v28 }
0x1178   :  { %v1871_v15 = vadd.f32 %v1869_v31, %v3313_v13 }
0x1179   :  { %3152 = vtanh.f32 %v1773_v34  ;;  %v2487_v38 = vmul.f32 -1.442695, %v1773_v34 }
0x117a   :  { %3154 = vtanh.f32 %v1871_v15  ;;  %v2489_v41 = vmul.f32 -1.442695, %v1871_v15 }
0x117b   :  { %3156 = vpow2.f32 %v2487_v38 }
0x117c   :  { %3158 = vpow2.f32 %v2489_v41 }
0x1183   :  { %v3153_v35 = vpop.eup %3152 }
0x1184   :  { %v3155_v37 = vpop.eup %3154  ;;  %1783 = vrot.lane.b32.xlu0 %v3153_v35, %s3219_s22 }
0x1185   :  { %1884 = vrot.lane.b32.xlu1 %v3155_v37, %s3219_s22  ;;  %v3157_v42 = vpop.eup %3156 }
0x1186   :  { %v3159_v43 = vpop.eup %3158  ;;  %v1777_v44 = vadd.f32 1.0, %v3157_v42 }
0x1187   :  { %v1875_v45 = vadd.f32 1.0, %v3159_v43 }
0x1188   :  { %3160 = vrcp.f32 %v1777_v44 }
0x1189   :  { %3162 = vrcp.f32 %v1875_v45 }
0x1192   :  { %v3161_v46 = vpop.eup %3160 }
0x1193   :  { %v3163_v49 = vpop.eup %3162  ;;  %v1781_v54 = vmul.f32 %v3161_v46, %v3553_v7 }
0x1194   :  { %v1882_v56 = vmul.f32 %v3163_v49, %v1880_v53 }
0x11f6   :  { %v1784_v48 = vpop.permute.xlu0 %1783 }
0x11f7   :  { %v1786_v50 = vmul.f32 %v3161_v46, %v1784_v48  ;;  %v1885_v51 = vpop.permute.xlu1 %1884 }
0x11f8   :  { %v1887_v52 = vmul.f32 %v3163_v49, %v1885_v51 }
0x11f9   :  { %1788 = vrot.lane.b32.xlu0 %v1786_v50, %s3220_s3 }
0x11fa   :  { %1889 = vrot.lane.b32.xlu1 %v1887_v52, %s3220_s3 }
0x126b   :  { %v1789_v55 = vpop.permute.xlu0 %1788 }
0x126c   :  { %v3593_v57 = vadd.f32 %v1789_v55, %v1781_v54  ;;  %v1890_v58 = vpop.permute.xlu1 %1889 }
0x126d   :  { %v3595_v59 = vadd.f32 %v1890_v58, %v1882_v56 }
0x126e   :  { %3164 = vtanh.f32 %v3593_v57 }
0x126f   :  { %3166 = vtanh.f32 %v3595_v59  ;;  %v2157_v31 = vrot.slane %v3595_v59, 6 }
0x1278   :  { %v3165_v60 = vpop.eup %3164 }
0x1279   :  { %v3167_v61 = vpop.eup %3166  ;;  %1794 = vrot.lane.b32.xlu0 %v3165_v60, %s3219_s22 }
0x127a   :  { %1895 = vrot.lane.b32.xlu1 %v3167_v61, %s3219_s22 }
0x12eb   :  { %v1795_v62 = vpop.permute.xlu0 %1794 }
0x12ec   :  { %v1797_v63 = vmul.f32 %v3161_v46, %v1795_v62  ;;  %v1896_v0 = vpop.permute.xlu1 %1895 }
0x12ed   :  { %v1898_v1 = vmul.f32 %v3163_v49, %v1896_v0  ;;  %v2355_v0 = vld [vmem:[%s3680_s7 + $0x10] sm:$0xff] }
0x12ee   :  { %1900 = vrot.lane.b32.xlu0 %v1797_v63, %s3220_s3  ;;  %v2354_v63 = vld [vmem:[%s3680_s7 + $0x8] sm:$0xff] }
0x12ef   :  { %v1975_v2 = vrot.slane %v1898_v1, 4 }
0x12f1   :  { %1976 = vrot.lane.b32.xlu1 %v1975_v2, %s3220_s3  ;;  %v2356_v2 = vld [vmem:[%s3680_s7 + $0x18] sm:$0xff] }
0x1360   :  { %v1901_v5 = vpop.permute.xlu0 %1900 }
0x1361   :  { %2851 = vmatmul.mubr.msk.f32.vlgmr.msra.gmra.mrb[20].mxu0 %vm142_vm3, %v1901_v5  ;;  %v3056_v5 = vpack.c.bf16 %v2356_v2, %v2355_v0 }
0x1362   :  { %3036 = vmatpush3.bf16.msra.mxu0 %v3282_v4  ;;  %2872 = vmatprep.mubr.msk.f32.mxu0 %vm3217_vm2, %v3218_v10 }
0x1363   :  { %v1977_v6 = vpop.permute.xlu1 %1976  ;;  %3037 = vmatprep.subr.bf16.mxu0 %v3216_v3 }
0x1364   :  { %2862 = vmatmul.mubr.msk.f32.vlgmr.msra.gmra.mrb[20].mxu1 %vm142_vm3, %v1977_v6 }
0x1365   :  { %3042 = vmatpush3.bf16.msra.mxu1 %v3332_v32  ;;  %2883 = vmatprep.mubr.msk.f32.mxu1 %vm3217_vm2, %v3218_v10 }
0x1366   :  { %3039 = vmatpush3.bf16.msra.mxu0 %v3297_v9  ;;  %3043 = vmatprep.subr.bf16.mxu1 %v3216_v3 }
0x1367   :  { %3046 = vmatprep.subr.bf16.mxu0 %v3216_v3 }
0x1369   :  { %2873 = vmatmul.mubr.msk.f32.vlgmr.msra.gmra.mrb[22].mxu0 %vm142_vm3, %v1977_v6  ;;  %3045 = vmatpush3.bf16.msra.mxu1 %v3352_v39 }
0x136a   :  { %3048 = vmatpush3.bf16.msra.mxu0 %v3343_v36  ;;  %2894 = vmatprep.mubr.msk.f32.mxu0 %vm3217_vm2, %v3218_v10 }
0x136b   :  { %3049 = vmatprep.subr.bf16.mxu0 %v3216_v3  ;;  %3052 = vmatprep.subr.bf16.mxu1 %v3216_v3 }
0x136e   :  { %3051 = vmatpush3.bf16.msra.mxu0 %v3356_v40 }
0x1434   :  { %v1970_v4 = vpop.f32.mrb[20].mxu0 }
0x1435   :  { %v2852_v9 = vpop.f32.mrb[21].mxu0 }
0x1437   :  { %v2046_v32 = vpop.f32.mrb[20].mxu1 }
0x1438   :  { %v2047_v7 = vadd.f32 %v2046_v32, %v1970_v4  ;;  %v2863_v8 = vpop.f32.mrb[21].mxu1 }
0x1439   :  { %v2498_v8 = vld [vmem:[%s3681_s8] ss:$0 sm:$0xff] }
0x143a   :  { %v2050_v11 = vadd.f32 %v3389_v47, %v2047_v7 }
0x143c   :  { %3168 = vtanh.f32 %v2050_v11  ;;  %v2141_v39 = vpop.f32.mrb[22].mxu0  ;;  %v2492_v40 = vmul.f32 -1.442695, %v2050_v11 }
0x143d   :  { %v2146_v12 = vrot.slane %v2141_v39, 2  ;;  %v2874_v36 = vpop.f32.mrb[23].mxu0 }
0x143f   :  { %v2148_v14 = vadd.f32 %v2146_v12, %v3313_v13 }
0x1441   :  { %3170 = vtanh.f32 %v2148_v14  ;;  %v2494_v18 = vmul.f32 -1.442695, %v2148_v14 }
0x1442   :  { %3172 = vpow2.f32 %v2492_v40 }
0x1443   :  { %3174 = vpow2.f32 %v2494_v18 }
0x1446   :  { %v3169_v16 = vpop.eup %3168 }
0x1447   :  { %2060 = vrot.lane.b32.xlu1 %v3169_v16, %s3219_s22 }
0x144b   :  { %v3171_v17 = vpop.eup %3170 }
0x144c   :  { %2161 = vrot.lane.b32.xlu0 %v3171_v17, %s3219_s22  ;;  %v3173_v19 = vpop.eup %3172 }
0x144d   :  { %v2054_v20 = vadd.f32 1.0, %v3173_v19  ;;  %v3175_v21 = vpop.eup %3174 }
0x144e   :  { %v2152_v22 = vadd.f32 1.0, %v3175_v21 }
0x144f   :  { %3176 = vrcp.f32 %v2054_v20 }
0x1450   :  { %3178 = vrcp.f32 %v2152_v22 }
0x1459   :  { %v3177_v23 = vpop.eup %3176 }
0x145a   :  { %v3179_v25 = vpop.eup %3178  ;;  %v2058_v28 = vmul.f32 %v3177_v23, %v3593_v57 }
0x145b   :  { %v2159_v33 = vmul.f32 %v3179_v25, %v2157_v31 }
0x14b9   :  { %v2061_v24 = vpop.permute.xlu1 %2060 }
0x14ba   :  { %v2063_v13 = vmul.f32 %v3177_v23, %v2061_v24 }
0x14bc   :  { %2065 = vrot.lane.b32.xlu1 %v2063_v13, %s3220_s3 }
0x14be   :  { %v2162_v26 = vpop.permute.xlu0 %2161 }
0x14bf   :  { %v2164_v27 = vmul.f32 %v3179_v25, %v2162_v26 }
0x14c1   :  { %2166 = vrot.lane.b32.xlu0 %v2164_v27, %s3220_s3 }
0x152e   :  { %v2066_v29 = vpop.permute.xlu1 %2065 }
0x152f   :  { %v2068_v30 = vadd.f32 %v2066_v29, %v2058_v28 }
0x1531   :  { %3180 = vtanh.f32 %v2068_v30 }
0x1533   :  { %v2167_v34 = vpop.permute.xlu0 %2166 }
0x1534   :  { %v2169_v15 = vadd.f32 %v2167_v34, %v2159_v33 }
0x1536   :  { %3182 = vtanh.f32 %v2169_v15 }
0x153b   :  { %v3181_v35 = vpop.eup %3180 }
0x153c   :  { %2071 = vrot.lane.b32.xlu1 %v3181_v35, %s3219_s22 }
0x1540   :  { %v3183_v37 = vpop.eup %3182 }
0x1541   :  { %2172 = vrot.lane.b32.xlu0 %v3183_v37, %s3219_s22 }
0x15ae   :  { %v2072_v38 = vpop.permute.xlu1 %2071 }
0x15af   :  { %v2074_v41 = vmul.f32 %v3177_v23, %v2072_v38 }
0x15b1   :  { %2177 = vrot.lane.b32.xlu0 %v2074_v41, %s3220_s3 }
0x15b3   :  { %v2173_v42 = vpop.permute.xlu0 %2172 }
0x15b4   :  { %v2175_v43 = vmul.f32 %v3179_v25, %v2173_v42 }
0x15b6   :  { %v2252_v44 = vrot.slane %v2175_v43, 6 }
0x15b8   :  { %2253 = vrot.lane.b32.xlu1 %v2252_v44, %s3220_s3 }
0x1623   :  { %v2178_v45 = vpop.permute.xlu0 %2177 }
0x1624   :  { %2884 = vmatmul.mubr.msk.f32.vlgmr.msra.gmra.mrb[22].mxu1 %vm142_vm3, %v2178_v45 }
0x1625   :  { %2905 = vmatprep.mubr.msk.f32.mxu1 %vm3217_vm2, %v3218_v10 }
0x162a   :  { %v2254_v46 = vpop.permute.xlu1 %2253 }
0x162b   :  { %2895 = vmatmul.mubr.msk.f32.vlgmr.msra.gmra.mrb[24].mxu0 %vm142_vm3, %v2254_v46 }
0x16f7   :  { %v2247_v48 = vpop.f32.mrb[22].mxu1 }
0x16f8   :  { %v2885_v49 = vpop.f32.mrb[23].mxu1 }
0x16fe   :  { %v2323_v50 = vpop.f32.mrb[24].mxu0 }
0x16ff   :  { %v2324_v51 = vadd.f32 %v2323_v50, %v2247_v48  ;;  %v2896_v52 = vpop.f32.mrb[25].mxu0 }
0x1701   :  { %v2327_v53 = vadd.f32 %v3389_v47, %v2324_v51  ;;  %v2353_v47 = vld [vmem:[%s3680_s7] sm:$0xff]  ;;  %s3221_s7 = smov [#allocation2]  }
0x1702   :  { %v3053_v1 = vpack.c.bf16 %v2354_v63, %v2353_v47  ;;  %s2447_s25 = sshll.u32 %s3221_s7, 4  ;;  %s2448_s25 = int_to_ptr.vmem [resolvable:$true] %s2447_s25 }
0x1703   :  { %3184 = vtanh.f32 %v2327_v53  ;;  %v2497_v55 = vmul.f32 -1.442695, %v2327_v53  ;;  %p3197_p1 = scmp.lt.s32.totalorder %s2448_s25, %s2448_s25 }
0x1704   :  { %3054 = vmatpush3.bf16.msra.mxu1 %v3053_v1 }
0x1705   :  { %3186 = vpow2.f32 %v2497_v55  ;;  %3055 = vmatprep.subr.bf16.mxu1 %v3216_v3 }
0x1708   :  { %3057 = vmatpush3.bf16.msra.mxu1 %v3056_v5 }
0x170d   :  { %v3185_v54 = vpop.eup %3184 }
0x170e   :  { %2337 = vrot.lane.b32.xlu0 %v3185_v54, %s3219_s22 }
0x170f   :  { %v3187_v56 = vpop.eup %3186 }
0x1710   :  { %v2331_v57 = vadd.f32 1.0, %v3187_v56 }
0x1712   :  { %3188 = vrcp.f32 %v2331_v57 }
0x171c   :  { %v3189_v10 = vpop.eup %3188 }
0x171d   :  { %v2335_v60 = vmul.f32 %v3189_v10, %v2068_v30 }
0x1780   :  { %v2338_v58 = vpop.permute.xlu0 %2337 }
0x1781   :  { %v2340_v59 = vmul.f32 %v3189_v10, %v2338_v58 }
0x1783   :  { %2342 = vrot.lane.b32.xlu1 %v2340_v59, %s3220_s3 }
0x17f5   :  { %v2343_v61 = vpop.permute.xlu1 %2342 }
0x17f6   :  { %v2345_v62 = vadd.f32 %v2343_v61, %v2335_v60 }
0x17f8   :  { %3190 = vtanh.f32 %v2345_v62 }
0x1802   :  { %v3191_v6 = vpop.eup %3190 }
0x1803   :  { %2348 = vrot.lane.b32.xlu0 %v3191_v6, %s3219_s22  ;;  %s3192_s22 = scalar_lea.vmem %s2448_s25, 32 }
0x1804   :  { %p3193_p0 = scmp.ne.s32.totalorder %s2448_s25, %s3192_s22  ;;  %p3198_p2 = scmp.lt.s32.totalorder %s3192_s22, %s3192_s22 }
0x1806   :  { %p3199_p3 = por %p3198_p2, %p3197_p1 }
0x1808   :  { %p3200_p4 = pnand %p3199_p3, %p3193_p0 }
0x1875   :  { %v2349_v4 = vpop.permute.xlu0 %2348 }
0x1876   :  { %v2351_v9 = vmul.f32 %v3189_v10, %v2349_v4 }
0x1878   :  { %v2352_v32 = vmax.f32 %v2351_v9, 0.0 }
0x187a   :  { %2365 = vrot.lane.b32.xlu1 %v2352_v32, %s3220_s3 }
0x18ec   :  { %v2366_v7 = vpop.permute.xlu1 %2365 }
0x18ed   :  { %2906 = vmatmul.mubr.msk.f32.vlgmr.msra.gmra.mrb[24].mxu1 %vm142_vm3, %v2366_v7 }
0x19c0   :  { %v2435_v11 = vpop.f32.mrb[24].mxu1 }
0x19c1   :  { %v2436_v3 = vadd.f32 %v2498_v8, %v2435_v11  ;;  %v2907_v39 = vpop.f32.mrb[25].mxu1 }
0x19c3   :  { %2440 = vst.msk [vmem:[#allocation2] sm:$0x3] %vm2439_vm4, %v2436_v3 }
0x19c4   :  { %3203 = shalt.err (!%p3200_p4)
}
0x19c5   :  { %s3204_s27 = scalar_lea.hbm %s3682_s9, 32 }
0x19c6   :  { %p3205_p5 = scmp.ne.s32.totalorder %s3682_s9, %s3204_s27  ;;  %p3208_p6 = scmp.lt.u32.totalorder %s3204_s27, %s3682_s9 }
0x19c8   :  { %p3210_p7 = pnand %p3208_p6, %p3205_p5 }
0x19ca   :  { %3213 = shalt.err (!%p3210_p7)
}
0x19cb   :  { %2450 = dma.vmem_to_hbm [thread:$0]  %s2448_s25, 32, %s3682_s9, [#allocation3]  }
0x19cc   :  { %3214 = dma.done.wait [#allocation3], 32  }
0x19cd   :  { %3215 = vsyncadd [#allocation3], 4294967264 }
0x19ce   :  { %2454 = vsyncpa [#allocation3], 1 }

</bundles_post_ra>
